<compile_context>
chip_gen: v5e
topology: v5e:2x2
jax: 0.10.0
libtpu: 0.0.40
codegen_flags: <defaults>
</compile_context>

<pallas_src>
import jax
import jax.numpy as jnp
from jax.experimental import pallas as pl
from jax.experimental.pallas import tpu as pltpu


# -----------------------------------------------------------------------------
# Wrapper-side weight transforms (pure layout plumbing, traced once under jit)
# -----------------------------------------------------------------------------
def _conv_band_matrices(w, w_in, w_pool):
    """Banded-matmul weights for a KHxKW conv whose W axis lives on lanes.

    w      : (Cout, Cin, KH, KW) PyTorch conv weight.
    w_in   : input width (input lanes are laid out as x_in*Cin + ci).
    w_pool : output width AFTER the following 2x2 max pool.

    Returns B with shape (KH, w_in*Cin, 2*w_pool*Cout) where
      B[dh, x_in*Cin+ci, rx*(w_pool*Cout) + px*Cout + co]
        = w[co, ci, dh, x_in - (2*px + rx)]   if 0 <= x_in-(2*px+rx) < KW else 0
    so that rows @ B[dh] computes all conv outputs at x_out = 2*px + rx with the
    pool-pair index rx split into two contiguous lane halves.
    """
    cout, cin, kh, kw = w.shape
    k_in = w_in * cin
    k_out = 2 * w_pool * cout

    row = jnp.arange(k_in)
    x_in = row // cin
    ci = row % cin
    col = jnp.arange(k_out)
    rx = col // (w_pool * cout)
    rem = col % (w_pool * cout)
    px = rem // cout
    co = rem % cout
    x_out = 2 * px + rx

    dw = x_in[:, None] - x_out[None, :]                      # (k_in, k_out)
    valid = (dw >= 0) & (dw < kw)
    dw_c = jnp.clip(dw, 0, kw - 1)

    co_b = co[None, :]
    ci_b = ci[:, None]
    bands = []
    for dh in range(kh):
        w_dh = w[:, :, dh, :]                                # (Cout, Cin, KW)
        vals = w_dh[co_b, ci_b, dw_c]                        # (k_in, k_out)
        bands.append(jnp.where(valid, vals, 0.0))
    return jnp.stack(bands, axis=0).astype(jnp.float32)      # (KH, k_in, k_out)


# -----------------------------------------------------------------------------
# Fused LeNet5 kernel: one grid step = one image
# -----------------------------------------------------------------------------
def _lenet5_kernel(xph_ref, c1m_ref, c1b_ref, c2m_ref, c2b_ref,
                   f1w_ref, f1b_ref, f2w_ref, f2b_ref, f3w_ref, f3b_ref,
                   out_ref):
    f32 = jnp.float32

    # ---- conv1 (5x5, pad=2, 1->6) + ReLU + 2x2 max-pool ---------------------
    # Pooled rows are produced split by parity of the pooled row index so that
    # the conv2 stage below only needs contiguous (unstrided) sublane slices.
    def conv1_pooled_rows(par):                  # par = parity of pooled row
        pooled = None
        for ry in range(2):                      # row inside the 2x2 pool window
            acc = jnp.zeros((7, 168), f32)
            for dh in range(5):                  # conv tap row
                s = 2 * par + ry + dh            # input row offset (mod-4 phased)
                rows = xph_ref[0, s % 4, s // 4:s // 4 + 7, :]        # (7, 32)
                acc = acc + jnp.dot(rows, c1m_ref[dh],
                                    preferred_element_type=f32)
            acc = jnp.maximum(acc + c1b_ref[...], 0.0)                # bias+ReLU
            pooled = acc if pooled is None else jnp.maximum(pooled, acc)
        # max over the two column phases rx: lanes [0:84] vs [84:168]
        return jnp.maximum(pooled[:, 0:84], pooled[:, 84:168])        # (7, 84)

    p1 = (conv1_pooled_rows(0), conv1_pooled_rows(1))  # pooled1 rows 2q / 2q+1

    # ---- conv2 (5x5, valid, 6->16) + ReLU + 2x2 max-pool --------------------
    m2 = None
    for ry2 in range(2):
        acc2 = jnp.zeros((5, 160), f32)
        for dh in range(5):
            t = ry2 + dh
            rows = p1[t % 2][t // 2:t // 2 + 5, :]                    # (5, 84)
            acc2 = acc2 + jnp.dot(rows, c2m_ref[dh],
                                  preferred_element_type=f32)
        acc2 = jnp.maximum(acc2 + c2b_ref[...], 0.0)
        m2 = acc2 if m2 is None else jnp.maximum(m2, acc2)
    pooled2 = jnp.maximum(m2[:, 0:80], m2[:, 80:160])                 # (5, 80)

    # ---- flatten + fc1/fc2/fc3 (all FC out-dims zero-padded to 128) --------
    # PyTorch's (C,H,W) flatten order is folded into f1w's row permutation, so
    # fc1 is a sum over the 5 pooled rows of (1,80)@(80,128) MXU dots.
    h = jnp.zeros((1, 128), f32)
    for r in range(5):
        h = h + jnp.dot(pooled2[r:r + 1, :], f1w_ref[r],
                        preferred_element_type=f32)
    h = jnp.maximum(h + f1b_ref[...], 0.0)
    h = jnp.maximum(jnp.dot(h, f2w_ref[...], preferred_element_type=f32)
                    + f2b_ref[...], 0.0)
    out_ref[0] = (jnp.dot(h, f3w_ref[...], preferred_element_type=f32)
                  + f3b_ref[...])


# -----------------------------------------------------------------------------
# Full forward pass (host-facing input is NCHW, like PyTorch)
# -----------------------------------------------------------------------------
def lenet5_forward(x_nchw, params):
    f32 = jnp.float32
    n = x_nchw.shape[0]
    # mnist/fashionmnist config of the module: in_channels == 1
    x = x_nchw.astype(f32)[:, 0, :, :]                      # (N, 28, 28)
    x = jnp.pad(x, ((0, 0), (2, 2), (2, 2)))                # conv1 padding=2
    # split rows by (y mod 4) so the kernel only needs contiguous sublane slices
    xph = jnp.stack([x[:, r::4, :] for r in range(4)], axis=1)   # (N, 4, 8, 32)

    c1m = _conv_band_matrices(params["conv1_w"], 32, 14)    # (5, 32, 168)
    c1b = jnp.tile(params["conv1_b"].astype(f32), 28).reshape(1, 168)
    c2m = _conv_band_matrices(params["conv2_w"], 14, 5)     # (5, 84, 160)
    c2b = jnp.tile(params["conv2_b"].astype(f32), 10).reshape(1, 160)

    # fc1: fold the NCHW flatten permutation into the weight; pad 120 -> 128
    lane = jnp.arange(80)
    wv, cv = lane // 16, lane % 16
    hv = jnp.arange(5)
    feat_idx = cv[None, :] * 25 + hv[:, None] * 5 + wv[None, :]      # (5, 80)
    f1w = jnp.pad(params["fc1_w"].astype(f32).T[feat_idx],
                  ((0, 0), (0, 0), (0, 8)))                          # (5, 80, 128)
    f1b = jnp.pad(params["fc1_b"].astype(f32), (0, 8)).reshape(1, 128)
    f2w = jnp.pad(params["fc2_w"].astype(f32).T, ((0, 8), (0, 44)))   # (128, 128)
    f2b = jnp.pad(params["fc2_b"].astype(f32), (0, 44)).reshape(1, 128)
    f3w = jnp.pad(params["fc3_w"].astype(f32).T, ((0, 44), (0, 118))) # (128, 128)
    f3b = jnp.pad(params["fc3_b"].astype(f32), (0, 118)).reshape(1, 128)

    out = pl.pallas_call(
        _lenet5_kernel,
        out_shape=jax.ShapeDtypeStruct((n, 1, 128), f32),
        grid=(n,),
        in_specs=[
            pl.BlockSpec((1, 4, 8, 32), lambda i: (i, 0, 0, 0)),
            pl.BlockSpec((5, 32, 168), lambda i: (0, 0, 0)),
            pl.BlockSpec((1, 168), lambda i: (0, 0)),
            pl.BlockSpec((5, 84, 160), lambda i: (0, 0, 0)),
            pl.BlockSpec((1, 160), lambda i: (0, 0)),
            pl.BlockSpec((5, 80, 128), lambda i: (0, 0, 0)),
            pl.BlockSpec((1, 128), lambda i: (0, 0)),
            pl.BlockSpec((128, 128), lambda i: (0, 0)),
            pl.BlockSpec((1, 128), lambda i: (0, 0)),
            pl.BlockSpec((128, 128), lambda i: (0, 0)),
            pl.BlockSpec((1, 128), lambda i: (0, 0)),
        ],
        out_specs=pl.BlockSpec((1, 1, 128), lambda i: (i, 0, 0)),
        compiler_params=pltpu.CompilerParams(
            dimension_semantics=("parallel",)),
    )(xph, c1m, c1b, c2m, c2b, f1w, f1b, f2w, f2b, f3w, f3b)
    return out[:, 0, :10]                                   # un-pad the logits


# -----------------------------------------------------------------------------
# Pure-JAX/XLA reference (PyTorch LeNet5 semantics) for a correctness check
# -----------------------------------------------------------------------------
def lenet5_reference(x, params):
    hi = jax.lax.Precision.HIGHEST
    act = lambda v: jnp.maximum(v, 0.0)
    y = jax.lax.conv_general_dilated(
        x, params["conv1_w"], (1, 1), ((2, 2), (2, 2)),
        dimension_numbers=("NCHW", "OIHW", "NCHW"), precision=hi)
    y = act(y + params["conv1_b"][None, :, None, None])
    y = jax.lax.reduce_window(y, -jnp.inf, jax.lax.max,
                              (1, 1, 2, 2), (1, 1, 2, 2), "VALID")
    y = jax.lax.conv_general_dilated(
        y, params["conv2_w"], (1, 1), "VALID",
        dimension_numbers=("NCHW", "OIHW", "NCHW"), precision=hi)
    y = act(y + params["conv2_b"][None, :, None, None])
    y = jax.lax.reduce_window(y, -jnp.inf, jax.lax.max,
                              (1, 1, 2, 2), (1, 1, 2, 2), "VALID")
    f = y.reshape(y.shape[0], -1)
    f = act(jnp.dot(f, params["fc1_w"].T, precision=hi) + params["fc1_b"])
    f = act(jnp.dot(f, params["fc2_w"].T, precision=hi) + params["fc2_b"])
    return jnp.dot(f, params["fc3_w"].T, precision=hi) + params["fc3_b"]


if __name__ == "__main__":
    key = jax.random.PRNGKey(0)
    keys = jax.random.split(key, 11)

    # mnist config: in_channels=1, 28x28 -> feat_len=400
    N, C_IN, H, W = 2, 1, 28, 28
    x = jax.random.normal(keys[0], (N, C_IN, H, W), dtype=jnp.float32)

    def uinit(k, shape, fan_in):
        bound = 1.0 / jnp.sqrt(jnp.float32(fan_in))
        return jax.random.uniform(k, shape, jnp.float32, -bound, bound)

    params = {
        "conv1_w": uinit(keys[1], (6, C_IN, 5, 5), C_IN * 25),
        "conv1_b": uinit(keys[2], (6,), C_IN * 25),
        "conv2_w": uinit(keys[3], (16, 6, 5, 5), 6 * 25),
        "conv2_b": uinit(keys[4], (16,), 6 * 25),
        "fc1_w": uinit(keys[5], (120, 400), 400),
        "fc1_b": uinit(keys[6], (120,), 400),
        "fc2_w": uinit(keys[7], (84, 120), 120),
        "fc2_b": uinit(keys[8], (84,), 120),
        "fc3_w": uinit(keys[9], (10, 84), 84),
        "fc3_b": uinit(keys[10], (10,), 84),
    }

    out = jax.jit(lenet5_forward)(x, params)
    jax.block_until_ready(out)
    assert out.shape == (N, 10) and out.dtype == jnp.float32

    ref = jax.jit(lenet5_reference)(x, params)
    jax.block_until_ready(ref)
    err = float(jnp.max(jnp.abs(out - ref)))
    assert err < 2e-3, f"max |pallas - reference| = {err}"

    print("KERNEL_OK")
</pallas_src>

<mosaic_0001>
module attributes {stable_mosaic.version = 11 : i64} {
  func.func @_lenet5_kernel(%arg0: i32, %arg1: memref<1x4x8x32xf32, #tpu.memory_space<vmem>>, %arg2: memref<5x32x168xf32, #tpu.memory_space<vmem>>, %arg3: memref<1x168xf32, #tpu.memory_space<vmem>>, %arg4: memref<5x84x160xf32, #tpu.memory_space<vmem>>, %arg5: memref<1x160xf32, #tpu.memory_space<vmem>>, %arg6: memref<5x80x128xf32, #tpu.memory_space<vmem>>, %arg7: memref<1x128xf32, #tpu.memory_space<vmem>>, %arg8: memref<128x128xf32, #tpu.memory_space<vmem>>, %arg9: memref<1x128xf32, #tpu.memory_space<vmem>>, %arg10: memref<128x128xf32, #tpu.memory_space<vmem>>, %arg11: memref<1x128xf32, #tpu.memory_space<vmem>>, %arg12: memref<1x1x128xf32, #tpu.memory_space<vmem>>) attributes {dimension_semantics = [#tpu.dimension_semantics<parallel>], iteration_bounds = array<i64: 2>, scalar_prefetch = 0 : i64, scratch_operands = 0 : i64, tpu.core_type = #tpu.core_type<tc>, window_params = [{transform_indices = @transform_0, window_bounds = array<i64: 1, 4, 8, 32>}, {pipeline_mode = #tpu.pipeline_mode<synchronous>, transform_indices = @transform_1, window_bounds = array<i64: 5, 32, 168>}, {pipeline_mode = #tpu.pipeline_mode<synchronous>, transform_indices = @transform_2, window_bounds = array<i64: 1, 168>}, {pipeline_mode = #tpu.pipeline_mode<synchronous>, transform_indices = @transform_3, window_bounds = array<i64: 5, 84, 160>}, {pipeline_mode = #tpu.pipeline_mode<synchronous>, transform_indices = @transform_4, window_bounds = array<i64: 1, 160>}, {pipeline_mode = #tpu.pipeline_mode<synchronous>, transform_indices = @transform_5, window_bounds = array<i64: 5, 80, 128>}, {pipeline_mode = #tpu.pipeline_mode<synchronous>, transform_indices = @transform_6, window_bounds = array<i64: 1, 128>}, {pipeline_mode = #tpu.pipeline_mode<synchronous>, transform_indices = @transform_7, window_bounds = array<i64: 128, 128>}, {pipeline_mode = #tpu.pipeline_mode<synchronous>, transform_indices = @transform_8, window_bounds = array<i64: 1, 128>}, {pipeline_mode = #tpu.pipeline_mode<synchronous>, transform_indices = @transform_9, window_bounds = array<i64: 128, 128>}, {pipeline_mode = #tpu.pipeline_mode<synchronous>, transform_indices = @transform_10, window_bounds = array<i64: 1, 128>}, {transform_indices = @transform_11, window_bounds = array<i64: 1, 1, 128>}]} {
    %cst = arith.constant 0.000000e+00 : f32
    %0 = vector.broadcast %cst : f32 to vector<7x168xf32>
    %c0 = arith.constant 0 : index
    %c0_0 = arith.constant 0 : index
    %c0_1 = arith.constant 0 : index
    %c0_2 = arith.constant 0 : index
    %1 = vector.load %arg1[%c0, %c0_0, %c0_1, %c0_2] : memref<1x4x8x32xf32, #tpu.memory_space<vmem>>, vector<1x1x7x32xf32>
    %2 = vector.shape_cast %1 : vector<1x1x7x32xf32> to vector<7x32xf32>
    %c0_3 = arith.constant 0 : index
    %c0_4 = arith.constant 0 : index
    %c0_5 = arith.constant 0 : index
    %3 = vector.load %arg2[%c0_3, %c0_4, %c0_5] : memref<5x32x168xf32, #tpu.memory_space<vmem>>, vector<1x32x168xf32>
    %4 = vector.shape_cast %3 : vector<1x32x168xf32> to vector<32x168xf32>
    %cst_6 = arith.constant dense<0.000000e+00> : vector<7x168xf32>
    %5 = tpu.matmul %2, %4, %cst_6 {dimension_numbers = #tpu.dot_dimension_numbers<[1], [0], [0], [1], [0, 0, 1, 1], [], []>} : vector<7x32xf32>, vector<32x168xf32>, vector<7x168xf32> -> vector<7x168xf32>
    %6 = arith.addf %0, %5 : vector<7x168xf32>
    %c0_7 = arith.constant 0 : index
    %c1 = arith.constant 1 : index
    %c0_8 = arith.constant 0 : index
    %c0_9 = arith.constant 0 : index
    %7 = vector.load %arg1[%c0_7, %c1, %c0_8, %c0_9] : memref<1x4x8x32xf32, #tpu.memory_space<vmem>>, vector<1x1x7x32xf32>
    %8 = vector.shape_cast %7 : vector<1x1x7x32xf32> to vector<7x32xf32>
    %c1_10 = arith.constant 1 : index
    %c0_11 = arith.constant 0 : index
    %c0_12 = arith.constant 0 : index
    %9 = vector.load %arg2[%c1_10, %c0_11, %c0_12] : memref<5x32x168xf32, #tpu.memory_space<vmem>>, vector<1x32x168xf32>
    %10 = vector.shape_cast %9 : vector<1x32x168xf32> to vector<32x168xf32>
    %cst_13 = arith.constant dense<0.000000e+00> : vector<7x168xf32>
    %11 = tpu.matmul %8, %10, %cst_13 {dimension_numbers = #tpu.dot_dimension_numbers<[1], [0], [0], [1], [0, 0, 1, 1], [], []>} : vector<7x32xf32>, vector<32x168xf32>, vector<7x168xf32> -> vector<7x168xf32>
    %12 = arith.addf %6, %11 : vector<7x168xf32>
    %c0_14 = arith.constant 0 : index
    %c2 = arith.constant 2 : index
    %c0_15 = arith.constant 0 : index
    %c0_16 = arith.constant 0 : index
    %13 = vector.load %arg1[%c0_14, %c2, %c0_15, %c0_16] : memref<1x4x8x32xf32, #tpu.memory_space<vmem>>, vector<1x1x7x32xf32>
    %14 = vector.shape_cast %13 : vector<1x1x7x32xf32> to vector<7x32xf32>
    %c2_17 = arith.constant 2 : index
    %c0_18 = arith.constant 0 : index
    %c0_19 = arith.constant 0 : index
    %15 = vector.load %arg2[%c2_17, %c0_18, %c0_19] : memref<5x32x168xf32, #tpu.memory_space<vmem>>, vector<1x32x168xf32>
    %16 = vector.shape_cast %15 : vector<1x32x168xf32> to vector<32x168xf32>
    %cst_20 = arith.constant dense<0.000000e+00> : vector<7x168xf32>
    %17 = tpu.matmul %14, %16, %cst_20 {dimension_numbers = #tpu.dot_dimension_numbers<[1], [0], [0], [1], [0, 0, 1, 1], [], []>} : vector<7x32xf32>, vector<32x168xf32>, vector<7x168xf32> -> vector<7x168xf32>
    %18 = arith.addf %12, %17 : vector<7x168xf32>
    %c0_21 = arith.constant 0 : index
    %c3 = arith.constant 3 : index
    %c0_22 = arith.constant 0 : index
    %c0_23 = arith.constant 0 : index
    %19 = vector.load %arg1[%c0_21, %c3, %c0_22, %c0_23] : memref<1x4x8x32xf32, #tpu.memory_space<vmem>>, vector<1x1x7x32xf32>
    %20 = vector.shape_cast %19 : vector<1x1x7x32xf32> to vector<7x32xf32>
    %c3_24 = arith.constant 3 : index
    %c0_25 = arith.constant 0 : index
    %c0_26 = arith.constant 0 : index
    %21 = vector.load %arg2[%c3_24, %c0_25, %c0_26] : memref<5x32x168xf32, #tpu.memory_space<vmem>>, vector<1x32x168xf32>
    %22 = vector.shape_cast %21 : vector<1x32x168xf32> to vector<32x168xf32>
    %cst_27 = arith.constant dense<0.000000e+00> : vector<7x168xf32>
    %23 = tpu.matmul %20, %22, %cst_27 {dimension_numbers = #tpu.dot_dimension_numbers<[1], [0], [0], [1], [0, 0, 1, 1], [], []>} : vector<7x32xf32>, vector<32x168xf32>, vector<7x168xf32> -> vector<7x168xf32>
    %24 = arith.addf %18, %23 : vector<7x168xf32>
    %c0_28 = arith.constant 0 : index
    %c0_29 = arith.constant 0 : index
    %c1_30 = arith.constant 1 : index
    %c0_31 = arith.constant 0 : index
    %25 = vector.load %arg1[%c0_28, %c0_29, %c1_30, %c0_31] : memref<1x4x8x32xf32, #tpu.memory_space<vmem>>, vector<1x1x7x32xf32>
    %26 = vector.shape_cast %25 : vector<1x1x7x32xf32> to vector<7x32xf32>
    %c4 = arith.constant 4 : index
    %c0_32 = arith.constant 0 : index
    %c0_33 = arith.constant 0 : index
    %27 = vector.load %arg2[%c4, %c0_32, %c0_33] : memref<5x32x168xf32, #tpu.memory_space<vmem>>, vector<1x32x168xf32>
    %28 = vector.shape_cast %27 : vector<1x32x168xf32> to vector<32x168xf32>
    %cst_34 = arith.constant dense<0.000000e+00> : vector<7x168xf32>
    %29 = tpu.matmul %26, %28, %cst_34 {dimension_numbers = #tpu.dot_dimension_numbers<[1], [0], [0], [1], [0, 0, 1, 1], [], []>} : vector<7x32xf32>, vector<32x168xf32>, vector<7x168xf32> -> vector<7x168xf32>
    %30 = arith.addf %24, %29 : vector<7x168xf32>
    %c0_35 = arith.constant 0 : index
    %c0_36 = arith.constant 0 : index
    %31 = vector.load %arg3[%c0_35, %c0_36] : memref<1x168xf32, #tpu.memory_space<vmem>>, vector<1x168xf32>
    %32 = vector.broadcast %31 : vector<1x168xf32> to vector<7x168xf32>
    %33 = arith.addf %30, %32 : vector<7x168xf32>
    %cst_37 = arith.constant 0.000000e+00 : f32
    %34 = vector.broadcast %cst_37 : f32 to vector<7x168xf32>
    %35 = arith.maximumf %33, %34 : vector<7x168xf32>
    %cst_38 = arith.constant 0.000000e+00 : f32
    %36 = vector.broadcast %cst_38 : f32 to vector<7x168xf32>
    %c0_39 = arith.constant 0 : index
    %c1_40 = arith.constant 1 : index
    %c0_41 = arith.constant 0 : index
    %c0_42 = arith.constant 0 : index
    %37 = vector.load %arg1[%c0_39, %c1_40, %c0_41, %c0_42] : memref<1x4x8x32xf32, #tpu.memory_space<vmem>>, vector<1x1x7x32xf32>
    %38 = vector.shape_cast %37 : vector<1x1x7x32xf32> to vector<7x32xf32>
    %c0_43 = arith.constant 0 : index
    %c0_44 = arith.constant 0 : index
    %c0_45 = arith.constant 0 : index
    %39 = vector.load %arg2[%c0_43, %c0_44, %c0_45] : memref<5x32x168xf32, #tpu.memory_space<vmem>>, vector<1x32x168xf32>
    %40 = vector.shape_cast %39 : vector<1x32x168xf32> to vector<32x168xf32>
    %cst_46 = arith.constant dense<0.000000e+00> : vector<7x168xf32>
    %41 = tpu.matmul %38, %40, %cst_46 {dimension_numbers = #tpu.dot_dimension_numbers<[1], [0], [0], [1], [0, 0, 1, 1], [], []>} : vector<7x32xf32>, vector<32x168xf32>, vector<7x168xf32> -> vector<7x168xf32>
    %42 = arith.addf %36, %41 : vector<7x168xf32>
    %c0_47 = arith.constant 0 : index
    %c2_48 = arith.constant 2 : index
    %c0_49 = arith.constant 0 : index
    %c0_50 = arith.constant 0 : index
    %43 = vector.load %arg1[%c0_47, %c2_48, %c0_49, %c0_50] : memref<1x4x8x32xf32, #tpu.memory_space<vmem>>, vector<1x1x7x32xf32>
    %44 = vector.shape_cast %43 : vector<1x1x7x32xf32> to vector<7x32xf32>
    %c1_51 = arith.constant 1 : index
    %c0_52 = arith.constant 0 : index
    %c0_53 = arith.constant 0 : index
    %45 = vector.load %arg2[%c1_51, %c0_52, %c0_53] : memref<5x32x168xf32, #tpu.memory_space<vmem>>, vector<1x32x168xf32>
    %46 = vector.shape_cast %45 : vector<1x32x168xf32> to vector<32x168xf32>
    %cst_54 = arith.constant dense<0.000000e+00> : vector<7x168xf32>
    %47 = tpu.matmul %44, %46, %cst_54 {dimension_numbers = #tpu.dot_dimension_numbers<[1], [0], [0], [1], [0, 0, 1, 1], [], []>} : vector<7x32xf32>, vector<32x168xf32>, vector<7x168xf32> -> vector<7x168xf32>
    %48 = arith.addf %42, %47 : vector<7x168xf32>
    %c0_55 = arith.constant 0 : index
    %c3_56 = arith.constant 3 : index
    %c0_57 = arith.constant 0 : index
    %c0_58 = arith.constant 0 : index
    %49 = vector.load %arg1[%c0_55, %c3_56, %c0_57, %c0_58] : memref<1x4x8x32xf32, #tpu.memory_space<vmem>>, vector<1x1x7x32xf32>
    %50 = vector.shape_cast %49 : vector<1x1x7x32xf32> to vector<7x32xf32>
    %c2_59 = arith.constant 2 : index
    %c0_60 = arith.constant 0 : index
    %c0_61 = arith.constant 0 : index
    %51 = vector.load %arg2[%c2_59, %c0_60, %c0_61] : memref<5x32x168xf32, #tpu.memory_space<vmem>>, vector<1x32x168xf32>
    %52 = vector.shape_cast %51 : vector<1x32x168xf32> to vector<32x168xf32>
    %cst_62 = arith.constant dense<0.000000e+00> : vector<7x168xf32>
    %53 = tpu.matmul %50, %52, %cst_62 {dimension_numbers = #tpu.dot_dimension_numbers<[1], [0], [0], [1], [0, 0, 1, 1], [], []>} : vector<7x32xf32>, vector<32x168xf32>, vector<7x168xf32> -> vector<7x168xf32>
    %54 = arith.addf %48, %53 : vector<7x168xf32>
    %c0_63 = arith.constant 0 : index
    %c0_64 = arith.constant 0 : index
    %c1_65 = arith.constant 1 : index
    %c0_66 = arith.constant 0 : index
    %55 = vector.load %arg1[%c0_63, %c0_64, %c1_65, %c0_66] : memref<1x4x8x32xf32, #tpu.memory_space<vmem>>, vector<1x1x7x32xf32>
    %56 = vector.shape_cast %55 : vector<1x1x7x32xf32> to vector<7x32xf32>
    %c3_67 = arith.constant 3 : index
    %c0_68 = arith.constant 0 : index
    %c0_69 = arith.constant 0 : index
    %57 = vector.load %arg2[%c3_67, %c0_68, %c0_69] : memref<5x32x168xf32, #tpu.memory_space<vmem>>, vector<1x32x168xf32>
    %58 = vector.shape_cast %57 : vector<1x32x168xf32> to vector<32x168xf32>
    %cst_70 = arith.constant dense<0.000000e+00> : vector<7x168xf32>
    %59 = tpu.matmul %56, %58, %cst_70 {dimension_numbers = #tpu.dot_dimension_numbers<[1], [0], [0], [1], [0, 0, 1, 1], [], []>} : vector<7x32xf32>, vector<32x168xf32>, vector<7x168xf32> -> vector<7x168xf32>
    %60 = arith.addf %54, %59 : vector<7x168xf32>
    %c0_71 = arith.constant 0 : index
    %c1_72 = arith.constant 1 : index
    %c1_73 = arith.constant 1 : index
    %c0_74 = arith.constant 0 : index
    %61 = vector.load %arg1[%c0_71, %c1_72, %c1_73, %c0_74] : memref<1x4x8x32xf32, #tpu.memory_space<vmem>>, vector<1x1x7x32xf32>
    %62 = vector.shape_cast %61 : vector<1x1x7x32xf32> to vector<7x32xf32>
    %c4_75 = arith.constant 4 : index
    %c0_76 = arith.constant 0 : index
    %c0_77 = arith.constant 0 : index
    %63 = vector.load %arg2[%c4_75, %c0_76, %c0_77] : memref<5x32x168xf32, #tpu.memory_space<vmem>>, vector<1x32x168xf32>
    %64 = vector.shape_cast %63 : vector<1x32x168xf32> to vector<32x168xf32>
    %cst_78 = arith.constant dense<0.000000e+00> : vector<7x168xf32>
    %65 = tpu.matmul %62, %64, %cst_78 {dimension_numbers = #tpu.dot_dimension_numbers<[1], [0], [0], [1], [0, 0, 1, 1], [], []>} : vector<7x32xf32>, vector<32x168xf32>, vector<7x168xf32> -> vector<7x168xf32>
    %66 = arith.addf %60, %65 : vector<7x168xf32>
    %c0_79 = arith.constant 0 : index
    %c0_80 = arith.constant 0 : index
    %67 = vector.load %arg3[%c0_79, %c0_80] : memref<1x168xf32, #tpu.memory_space<vmem>>, vector<1x168xf32>
    %68 = vector.broadcast %67 : vector<1x168xf32> to vector<7x168xf32>
    %69 = arith.addf %66, %68 : vector<7x168xf32>
    %cst_81 = arith.constant 0.000000e+00 : f32
    %70 = vector.broadcast %cst_81 : f32 to vector<7x168xf32>
    %71 = arith.maximumf %69, %70 : vector<7x168xf32>
    %72 = arith.maximumf %35, %71 : vector<7x168xf32>
    %73 = vector.extract_strided_slice %72 {offsets = [0, 0], sizes = [7, 84], strides = [1, 1]} : vector<7x168xf32> to vector<7x84xf32>
    %74 = vector.extract_strided_slice %72 {offsets = [0, 84], sizes = [7, 84], strides = [1, 1]} : vector<7x168xf32> to vector<7x84xf32>
    %75 = arith.maximumf %73, %74 : vector<7x84xf32>
    %cst_82 = arith.constant 0.000000e+00 : f32
    %76 = vector.broadcast %cst_82 : f32 to vector<7x168xf32>
    %c0_83 = arith.constant 0 : index
    %c2_84 = arith.constant 2 : index
    %c0_85 = arith.constant 0 : index
    %c0_86 = arith.constant 0 : index
    %77 = vector.load %arg1[%c0_83, %c2_84, %c0_85, %c0_86] : memref<1x4x8x32xf32, #tpu.memory_space<vmem>>, vector<1x1x7x32xf32>
    %78 = vector.shape_cast %77 : vector<1x1x7x32xf32> to vector<7x32xf32>
    %c0_87 = arith.constant 0 : index
    %c0_88 = arith.constant 0 : index
    %c0_89 = arith.constant 0 : index
    %79 = vector.load %arg2[%c0_87, %c0_88, %c0_89] : memref<5x32x168xf32, #tpu.memory_space<vmem>>, vector<1x32x168xf32>
    %80 = vector.shape_cast %79 : vector<1x32x168xf32> to vector<32x168xf32>
    %cst_90 = arith.constant dense<0.000000e+00> : vector<7x168xf32>
    %81 = tpu.matmul %78, %80, %cst_90 {dimension_numbers = #tpu.dot_dimension_numbers<[1], [0], [0], [1], [0, 0, 1, 1], [], []>} : vector<7x32xf32>, vector<32x168xf32>, vector<7x168xf32> -> vector<7x168xf32>
    %82 = arith.addf %76, %81 : vector<7x168xf32>
    %c0_91 = arith.constant 0 : index
    %c3_92 = arith.constant 3 : index
    %c0_93 = arith.constant 0 : index
    %c0_94 = arith.constant 0 : index
    %83 = vector.load %arg1[%c0_91, %c3_92, %c0_93, %c0_94] : memref<1x4x8x32xf32, #tpu.memory_space<vmem>>, vector<1x1x7x32xf32>
    %84 = vector.shape_cast %83 : vector<1x1x7x32xf32> to vector<7x32xf32>
    %c1_95 = arith.constant 1 : index
    %c0_96 = arith.constant 0 : index
    %c0_97 = arith.constant 0 : index
    %85 = vector.load %arg2[%c1_95, %c0_96, %c0_97] : memref<5x32x168xf32, #tpu.memory_space<vmem>>, vector<1x32x168xf32>
    %86 = vector.shape_cast %85 : vector<1x32x168xf32> to vector<32x168xf32>
    %cst_98 = arith.constant dense<0.000000e+00> : vector<7x168xf32>
    %87 = tpu.matmul %84, %86, %cst_98 {dimension_numbers = #tpu.dot_dimension_numbers<[1], [0], [0], [1], [0, 0, 1, 1], [], []>} : vector<7x32xf32>, vector<32x168xf32>, vector<7x168xf32> -> vector<7x168xf32>
    %88 = arith.addf %82, %87 : vector<7x168xf32>
    %c0_99 = arith.constant 0 : index
    %c0_100 = arith.constant 0 : index
    %c1_101 = arith.constant 1 : index
    %c0_102 = arith.constant 0 : index
    %89 = vector.load %arg1[%c0_99, %c0_100, %c1_101, %c0_102] : memref<1x4x8x32xf32, #tpu.memory_space<vmem>>, vector<1x1x7x32xf32>
    %90 = vector.shape_cast %89 : vector<1x1x7x32xf32> to vector<7x32xf32>
    %c2_103 = arith.constant 2 : index
    %c0_104 = arith.constant 0 : index
    %c0_105 = arith.constant 0 : index
    %91 = vector.load %arg2[%c2_103, %c0_104, %c0_105] : memref<5x32x168xf32, #tpu.memory_space<vmem>>, vector<1x32x168xf32>
    %92 = vector.shape_cast %91 : vector<1x32x168xf32> to vector<32x168xf32>
    %cst_106 = arith.constant dense<0.000000e+00> : vector<7x168xf32>
    %93 = tpu.matmul %90, %92, %cst_106 {dimension_numbers = #tpu.dot_dimension_numbers<[1], [0], [0], [1], [0, 0, 1, 1], [], []>} : vector<7x32xf32>, vector<32x168xf32>, vector<7x168xf32> -> vector<7x168xf32>
    %94 = arith.addf %88, %93 : vector<7x168xf32>
    %c0_107 = arith.constant 0 : index
    %c1_108 = arith.constant 1 : index
    %c1_109 = arith.constant 1 : index
    %c0_110 = arith.constant 0 : index
    %95 = vector.load %arg1[%c0_107, %c1_108, %c1_109, %c0_110] : memref<1x4x8x32xf32, #tpu.memory_space<vmem>>, vector<1x1x7x32xf32>
    %96 = vector.shape_cast %95 : vector<1x1x7x32xf32> to vector<7x32xf32>
    %c3_111 = arith.constant 3 : index
    %c0_112 = arith.constant 0 : index
    %c0_113 = arith.constant 0 : index
    %97 = vector.load %arg2[%c3_111, %c0_112, %c0_113] : memref<5x32x168xf32, #tpu.memory_space<vmem>>, vector<1x32x168xf32>
    %98 = vector.shape_cast %97 : vector<1x32x168xf32> to vector<32x168xf32>
    %cst_114 = arith.constant dense<0.000000e+00> : vector<7x168xf32>
    %99 = tpu.matmul %96, %98, %cst_114 {dimension_numbers = #tpu.dot_dimension_numbers<[1], [0], [0], [1], [0, 0, 1, 1], [], []>} : vector<7x32xf32>, vector<32x168xf32>, vector<7x168xf32> -> vector<7x168xf32>
    %100 = arith.addf %94, %99 : vector<7x168xf32>
    %c0_115 = arith.constant 0 : index
    %c2_116 = arith.constant 2 : index
    %c1_117 = arith.constant 1 : index
    %c0_118 = arith.constant 0 : index
    %101 = vector.load %arg1[%c0_115, %c2_116, %c1_117, %c0_118] : memref<1x4x8x32xf32, #tpu.memory_space<vmem>>, vector<1x1x7x32xf32>
    %102 = vector.shape_cast %101 : vector<1x1x7x32xf32> to vector<7x32xf32>
    %c4_119 = arith.constant 4 : index
    %c0_120 = arith.constant 0 : index
    %c0_121 = arith.constant 0 : index
    %103 = vector.load %arg2[%c4_119, %c0_120, %c0_121] : memref<5x32x168xf32, #tpu.memory_space<vmem>>, vector<1x32x168xf32>
    %104 = vector.shape_cast %103 : vector<1x32x168xf32> to vector<32x168xf32>
    %cst_122 = arith.constant dense<0.000000e+00> : vector<7x168xf32>
    %105 = tpu.matmul %102, %104, %cst_122 {dimension_numbers = #tpu.dot_dimension_numbers<[1], [0], [0], [1], [0, 0, 1, 1], [], []>} : vector<7x32xf32>, vector<32x168xf32>, vector<7x168xf32> -> vector<7x168xf32>
    %106 = arith.addf %100, %105 : vector<7x168xf32>
    %c0_123 = arith.constant 0 : index
    %c0_124 = arith.constant 0 : index
    %107 = vector.load %arg3[%c0_123, %c0_124] : memref<1x168xf32, #tpu.memory_space<vmem>>, vector<1x168xf32>
    %108 = vector.broadcast %107 : vector<1x168xf32> to vector<7x168xf32>
    %109 = arith.addf %106, %108 : vector<7x168xf32>
    %cst_125 = arith.constant 0.000000e+00 : f32
    %110 = vector.broadcast %cst_125 : f32 to vector<7x168xf32>
    %111 = arith.maximumf %109, %110 : vector<7x168xf32>
    %cst_126 = arith.constant 0.000000e+00 : f32
    %112 = vector.broadcast %cst_126 : f32 to vector<7x168xf32>
    %c0_127 = arith.constant 0 : index
    %c3_128 = arith.constant 3 : index
    %c0_129 = arith.constant 0 : index
    %c0_130 = arith.constant 0 : index
    %113 = vector.load %arg1[%c0_127, %c3_128, %c0_129, %c0_130] : memref<1x4x8x32xf32, #tpu.memory_space<vmem>>, vector<1x1x7x32xf32>
    %114 = vector.shape_cast %113 : vector<1x1x7x32xf32> to vector<7x32xf32>
    %c0_131 = arith.constant 0 : index
    %c0_132 = arith.constant 0 : index
    %c0_133 = arith.constant 0 : index
    %115 = vector.load %arg2[%c0_131, %c0_132, %c0_133] : memref<5x32x168xf32, #tpu.memory_space<vmem>>, vector<1x32x168xf32>
    %116 = vector.shape_cast %115 : vector<1x32x168xf32> to vector<32x168xf32>
    %cst_134 = arith.constant dense<0.000000e+00> : vector<7x168xf32>
    %117 = tpu.matmul %114, %116, %cst_134 {dimension_numbers = #tpu.dot_dimension_numbers<[1], [0], [0], [1], [0, 0, 1, 1], [], []>} : vector<7x32xf32>, vector<32x168xf32>, vector<7x168xf32> -> vector<7x168xf32>
    %118 = arith.addf %112, %117 : vector<7x168xf32>
    %c0_135 = arith.constant 0 : index
    %c0_136 = arith.constant 0 : index
    %c1_137 = arith.constant 1 : index
    %c0_138 = arith.constant 0 : index
    %119 = vector.load %arg1[%c0_135, %c0_136, %c1_137, %c0_138] : memref<1x4x8x32xf32, #tpu.memory_space<vmem>>, vector<1x1x7x32xf32>
    %120 = vector.shape_cast %119 : vector<1x1x7x32xf32> to vector<7x32xf32>
    %c1_139 = arith.constant 1 : index
    %c0_140 = arith.constant 0 : index
    %c0_141 = arith.constant 0 : index
    %121 = vector.load %arg2[%c1_139, %c0_140, %c0_141] : memref<5x32x168xf32, #tpu.memory_space<vmem>>, vector<1x32x168xf32>
    %122 = vector.shape_cast %121 : vector<1x32x168xf32> to vector<32x168xf32>
    %cst_142 = arith.constant dense<0.000000e+00> : vector<7x168xf32>
    %123 = tpu.matmul %120, %122, %cst_142 {dimension_numbers = #tpu.dot_dimension_numbers<[1], [0], [0], [1], [0, 0, 1, 1], [], []>} : vector<7x32xf32>, vector<32x168xf32>, vector<7x168xf32> -> vector<7x168xf32>
    %124 = arith.addf %118, %123 : vector<7x168xf32>
    %c0_143 = arith.constant 0 : index
    %c1_144 = arith.constant 1 : index
    %c1_145 = arith.constant 1 : index
    %c0_146 = arith.constant 0 : index
    %125 = vector.load %arg1[%c0_143, %c1_144, %c1_145, %c0_146] : memref<1x4x8x32xf32, #tpu.memory_space<vmem>>, vector<1x1x7x32xf32>
    %126 = vector.shape_cast %125 : vector<1x1x7x32xf32> to vector<7x32xf32>
    %c2_147 = arith.constant 2 : index
    %c0_148 = arith.constant 0 : index
    %c0_149 = arith.constant 0 : index
    %127 = vector.load %arg2[%c2_147, %c0_148, %c0_149] : memref<5x32x168xf32, #tpu.memory_space<vmem>>, vector<1x32x168xf32>
    %128 = vector.shape_cast %127 : vector<1x32x168xf32> to vector<32x168xf32>
    %cst_150 = arith.constant dense<0.000000e+00> : vector<7x168xf32>
    %129 = tpu.matmul %126, %128, %cst_150 {dimension_numbers = #tpu.dot_dimension_numbers<[1], [0], [0], [1], [0, 0, 1, 1], [], []>} : vector<7x32xf32>, vector<32x168xf32>, vector<7x168xf32> -> vector<7x168xf32>
    %130 = arith.addf %124, %129 : vector<7x168xf32>
    %c0_151 = arith.constant 0 : index
    %c2_152 = arith.constant 2 : index
    %c1_153 = arith.constant 1 : index
    %c0_154 = arith.constant 0 : index
    %131 = vector.load %arg1[%c0_151, %c2_152, %c1_153, %c0_154] : memref<1x4x8x32xf32, #tpu.memory_space<vmem>>, vector<1x1x7x32xf32>
    %132 = vector.shape_cast %131 : vector<1x1x7x32xf32> to vector<7x32xf32>
    %c3_155 = arith.constant 3 : index
    %c0_156 = arith.constant 0 : index
    %c0_157 = arith.constant 0 : index
    %133 = vector.load %arg2[%c3_155, %c0_156, %c0_157] : memref<5x32x168xf32, #tpu.memory_space<vmem>>, vector<1x32x168xf32>
    %134 = vector.shape_cast %133 : vector<1x32x168xf32> to vector<32x168xf32>
    %cst_158 = arith.constant dense<0.000000e+00> : vector<7x168xf32>
    %135 = tpu.matmul %132, %134, %cst_158 {dimension_numbers = #tpu.dot_dimension_numbers<[1], [0], [0], [1], [0, 0, 1, 1], [], []>} : vector<7x32xf32>, vector<32x168xf32>, vector<7x168xf32> -> vector<7x168xf32>
    %136 = arith.addf %130, %135 : vector<7x168xf32>
    %c0_159 = arith.constant 0 : index
    %c3_160 = arith.constant 3 : index
    %c1_161 = arith.constant 1 : index
    %c0_162 = arith.constant 0 : index
    %137 = vector.load %arg1[%c0_159, %c3_160, %c1_161, %c0_162] : memref<1x4x8x32xf32, #tpu.memory_space<vmem>>, vector<1x1x7x32xf32>
    %138 = vector.shape_cast %137 : vector<1x1x7x32xf32> to vector<7x32xf32>
    %c4_163 = arith.constant 4 : index
    %c0_164 = arith.constant 0 : index
    %c0_165 = arith.constant 0 : index
    %139 = vector.load %arg2[%c4_163, %c0_164, %c0_165] : memref<5x32x168xf32, #tpu.memory_space<vmem>>, vector<1x32x168xf32>
    %140 = vector.shape_cast %139 : vector<1x32x168xf32> to vector<32x168xf32>
    %cst_166 = arith.constant dense<0.000000e+00> : vector<7x168xf32>
    %141 = tpu.matmul %138, %140, %cst_166 {dimension_numbers = #tpu.dot_dimension_numbers<[1], [0], [0], [1], [0, 0, 1, 1], [], []>} : vector<7x32xf32>, vector<32x168xf32>, vector<7x168xf32> -> vector<7x168xf32>
    %142 = arith.addf %136, %141 : vector<7x168xf32>
    %c0_167 = arith.constant 0 : index
    %c0_168 = arith.constant 0 : index
    %143 = vector.load %arg3[%c0_167, %c0_168] : memref<1x168xf32, #tpu.memory_space<vmem>>, vector<1x168xf32>
    %144 = vector.broadcast %143 : vector<1x168xf32> to vector<7x168xf32>
    %145 = arith.addf %142, %144 : vector<7x168xf32>
    %cst_169 = arith.constant 0.000000e+00 : f32
    %146 = vector.broadcast %cst_169 : f32 to vector<7x168xf32>
    %147 = arith.maximumf %145, %146 : vector<7x168xf32>
    %148 = arith.maximumf %111, %147 : vector<7x168xf32>
    %149 = vector.extract_strided_slice %148 {offsets = [0, 0], sizes = [7, 84], strides = [1, 1]} : vector<7x168xf32> to vector<7x84xf32>
    %150 = vector.extract_strided_slice %148 {offsets = [0, 84], sizes = [7, 84], strides = [1, 1]} : vector<7x168xf32> to vector<7x84xf32>
    %151 = arith.maximumf %149, %150 : vector<7x84xf32>
    %cst_170 = arith.constant 0.000000e+00 : f32
    %152 = vector.broadcast %cst_170 : f32 to vector<5x160xf32>
    %153 = vector.extract_strided_slice %75 {offsets = [0, 0], sizes = [5, 84], strides = [1, 1]} : vector<7x84xf32> to vector<5x84xf32>
    %c0_171 = arith.constant 0 : index
    %c0_172 = arith.constant 0 : index
    %c0_173 = arith.constant 0 : index
    %154 = vector.load %arg4[%c0_171, %c0_172, %c0_173] : memref<5x84x160xf32, #tpu.memory_space<vmem>>, vector<1x84x160xf32>
    %155 = vector.shape_cast %154 : vector<1x84x160xf32> to vector<84x160xf32>
    %cst_174 = arith.constant dense<0.000000e+00> : vector<5x160xf32>
    %156 = tpu.matmul %153, %155, %cst_174 {dimension_numbers = #tpu.dot_dimension_numbers<[1], [0], [0], [1], [0, 0, 1, 1], [], []>} : vector<5x84xf32>, vector<84x160xf32>, vector<5x160xf32> -> vector<5x160xf32>
    %157 = arith.addf %152, %156 : vector<5x160xf32>
    %158 = vector.extract_strided_slice %151 {offsets = [0, 0], sizes = [5, 84], strides = [1, 1]} : vector<7x84xf32> to vector<5x84xf32>
    %c1_175 = arith.constant 1 : index
    %c0_176 = arith.constant 0 : index
    %c0_177 = arith.constant 0 : index
    %159 = vector.load %arg4[%c1_175, %c0_176, %c0_177] : memref<5x84x160xf32, #tpu.memory_space<vmem>>, vector<1x84x160xf32>
    %160 = vector.shape_cast %159 : vector<1x84x160xf32> to vector<84x160xf32>
    %cst_178 = arith.constant dense<0.000000e+00> : vector<5x160xf32>
    %161 = tpu.matmul %158, %160, %cst_178 {dimension_numbers = #tpu.dot_dimension_numbers<[1], [0], [0], [1], [0, 0, 1, 1], [], []>} : vector<5x84xf32>, vector<84x160xf32>, vector<5x160xf32> -> vector<5x160xf32>
    %162 = arith.addf %157, %161 : vector<5x160xf32>
    %163 = vector.extract_strided_slice %75 {offsets = [1, 0], sizes = [5, 84], strides = [1, 1]} : vector<7x84xf32> to vector<5x84xf32>
    %c2_179 = arith.constant 2 : index
    %c0_180 = arith.constant 0 : index
    %c0_181 = arith.constant 0 : index
    %164 = vector.load %arg4[%c2_179, %c0_180, %c0_181] : memref<5x84x160xf32, #tpu.memory_space<vmem>>, vector<1x84x160xf32>
    %165 = vector.shape_cast %164 : vector<1x84x160xf32> to vector<84x160xf32>
    %cst_182 = arith.constant dense<0.000000e+00> : vector<5x160xf32>
    %166 = tpu.matmul %163, %165, %cst_182 {dimension_numbers = #tpu.dot_dimension_numbers<[1], [0], [0], [1], [0, 0, 1, 1], [], []>} : vector<5x84xf32>, vector<84x160xf32>, vector<5x160xf32> -> vector<5x160xf32>
    %167 = arith.addf %162, %166 : vector<5x160xf32>
    %168 = vector.extract_strided_slice %151 {offsets = [1, 0], sizes = [5, 84], strides = [1, 1]} : vector<7x84xf32> to vector<5x84xf32>
    %c3_183 = arith.constant 3 : index
    %c0_184 = arith.constant 0 : index
    %c0_185 = arith.constant 0 : index
    %169 = vector.load %arg4[%c3_183, %c0_184, %c0_185] : memref<5x84x160xf32, #tpu.memory_space<vmem>>, vector<1x84x160xf32>
    %170 = vector.shape_cast %169 : vector<1x84x160xf32> to vector<84x160xf32>
    %cst_186 = arith.constant dense<0.000000e+00> : vector<5x160xf32>
    %171 = tpu.matmul %168, %170, %cst_186 {dimension_numbers = #tpu.dot_dimension_numbers<[1], [0], [0], [1], [0, 0, 1, 1], [], []>} : vector<5x84xf32>, vector<84x160xf32>, vector<5x160xf32> -> vector<5x160xf32>
    %172 = arith.addf %167, %171 : vector<5x160xf32>
    %173 = vector.extract_strided_slice %75 {offsets = [2, 0], sizes = [5, 84], strides = [1, 1]} : vector<7x84xf32> to vector<5x84xf32>
    %c4_187 = arith.constant 4 : index
    %c0_188 = arith.constant 0 : index
    %c0_189 = arith.constant 0 : index
    %174 = vector.load %arg4[%c4_187, %c0_188, %c0_189] : memref<5x84x160xf32, #tpu.memory_space<vmem>>, vector<1x84x160xf32>
    %175 = vector.shape_cast %174 : vector<1x84x160xf32> to vector<84x160xf32>
    %cst_190 = arith.constant dense<0.000000e+00> : vector<5x160xf32>
    %176 = tpu.matmul %173, %175, %cst_190 {dimension_numbers = #tpu.dot_dimension_numbers<[1], [0], [0], [1], [0, 0, 1, 1], [], []>} : vector<5x84xf32>, vector<84x160xf32>, vector<5x160xf32> -> vector<5x160xf32>
    %177 = arith.addf %172, %176 : vector<5x160xf32>
    %c0_191 = arith.constant 0 : index
    %c0_192 = arith.constant 0 : index
    %178 = vector.load %arg5[%c0_191, %c0_192] : memref<1x160xf32, #tpu.memory_space<vmem>>, vector<1x160xf32>
    %179 = vector.broadcast %178 : vector<1x160xf32> to vector<5x160xf32>
    %180 = arith.addf %177, %179 : vector<5x160xf32>
    %cst_193 = arith.constant 0.000000e+00 : f32
    %181 = vector.broadcast %cst_193 : f32 to vector<5x160xf32>
    %182 = arith.maximumf %180, %181 : vector<5x160xf32>
    %cst_194 = arith.constant 0.000000e+00 : f32
    %183 = vector.broadcast %cst_194 : f32 to vector<5x160xf32>
    %184 = vector.extract_strided_slice %151 {offsets = [0, 0], sizes = [5, 84], strides = [1, 1]} : vector<7x84xf32> to vector<5x84xf32>
    %c0_195 = arith.constant 0 : index
    %c0_196 = arith.constant 0 : index
    %c0_197 = arith.constant 0 : index
    %185 = vector.load %arg4[%c0_195, %c0_196, %c0_197] : memref<5x84x160xf32, #tpu.memory_space<vmem>>, vector<1x84x160xf32>
    %186 = vector.shape_cast %185 : vector<1x84x160xf32> to vector<84x160xf32>
    %cst_198 = arith.constant dense<0.000000e+00> : vector<5x160xf32>
    %187 = tpu.matmul %184, %186, %cst_198 {dimension_numbers = #tpu.dot_dimension_numbers<[1], [0], [0], [1], [0, 0, 1, 1], [], []>} : vector<5x84xf32>, vector<84x160xf32>, vector<5x160xf32> -> vector<5x160xf32>
    %188 = arith.addf %183, %187 : vector<5x160xf32>
    %189 = vector.extract_strided_slice %75 {offsets = [1, 0], sizes = [5, 84], strides = [1, 1]} : vector<7x84xf32> to vector<5x84xf32>
    %c1_199 = arith.constant 1 : index
    %c0_200 = arith.constant 0 : index
    %c0_201 = arith.constant 0 : index
    %190 = vector.load %arg4[%c1_199, %c0_200, %c0_201] : memref<5x84x160xf32, #tpu.memory_space<vmem>>, vector<1x84x160xf32>
    %191 = vector.shape_cast %190 : vector<1x84x160xf32> to vector<84x160xf32>
    %cst_202 = arith.constant dense<0.000000e+00> : vector<5x160xf32>
    %192 = tpu.matmul %189, %191, %cst_202 {dimension_numbers = #tpu.dot_dimension_numbers<[1], [0], [0], [1], [0, 0, 1, 1], [], []>} : vector<5x84xf32>, vector<84x160xf32>, vector<5x160xf32> -> vector<5x160xf32>
    %193 = arith.addf %188, %192 : vector<5x160xf32>
    %194 = vector.extract_strided_slice %151 {offsets = [1, 0], sizes = [5, 84], strides = [1, 1]} : vector<7x84xf32> to vector<5x84xf32>
    %c2_203 = arith.constant 2 : index
    %c0_204 = arith.constant 0 : index
    %c0_205 = arith.constant 0 : index
    %195 = vector.load %arg4[%c2_203, %c0_204, %c0_205] : memref<5x84x160xf32, #tpu.memory_space<vmem>>, vector<1x84x160xf32>
    %196 = vector.shape_cast %195 : vector<1x84x160xf32> to vector<84x160xf32>
    %cst_206 = arith.constant dense<0.000000e+00> : vector<5x160xf32>
    %197 = tpu.matmul %194, %196, %cst_206 {dimension_numbers = #tpu.dot_dimension_numbers<[1], [0], [0], [1], [0, 0, 1, 1], [], []>} : vector<5x84xf32>, vector<84x160xf32>, vector<5x160xf32> -> vector<5x160xf32>
    %198 = arith.addf %193, %197 : vector<5x160xf32>
    %199 = vector.extract_strided_slice %75 {offsets = [2, 0], sizes = [5, 84], strides = [1, 1]} : vector<7x84xf32> to vector<5x84xf32>
    %c3_207 = arith.constant 3 : index
    %c0_208 = arith.constant 0 : index
    %c0_209 = arith.constant 0 : index
    %200 = vector.load %arg4[%c3_207, %c0_208, %c0_209] : memref<5x84x160xf32, #tpu.memory_space<vmem>>, vector<1x84x160xf32>
    %201 = vector.shape_cast %200 : vector<1x84x160xf32> to vector<84x160xf32>
    %cst_210 = arith.constant dense<0.000000e+00> : vector<5x160xf32>
    %202 = tpu.matmul %199, %201, %cst_210 {dimension_numbers = #tpu.dot_dimension_numbers<[1], [0], [0], [1], [0, 0, 1, 1], [], []>} : vector<5x84xf32>, vector<84x160xf32>, vector<5x160xf32> -> vector<5x160xf32>
    %203 = arith.addf %198, %202 : vector<5x160xf32>
    %204 = vector.extract_strided_slice %151 {offsets = [2, 0], sizes = [5, 84], strides = [1, 1]} : vector<7x84xf32> to vector<5x84xf32>
    %c4_211 = arith.constant 4 : index
    %c0_212 = arith.constant 0 : index
    %c0_213 = arith.constant 0 : index
    %205 = vector.load %arg4[%c4_211, %c0_212, %c0_213] : memref<5x84x160xf32, #tpu.memory_space<vmem>>, vector<1x84x160xf32>
    %206 = vector.shape_cast %205 : vector<1x84x160xf32> to vector<84x160xf32>
    %cst_214 = arith.constant dense<0.000000e+00> : vector<5x160xf32>
    %207 = tpu.matmul %204, %206, %cst_214 {dimension_numbers = #tpu.dot_dimension_numbers<[1], [0], [0], [1], [0, 0, 1, 1], [], []>} : vector<5x84xf32>, vector<84x160xf32>, vector<5x160xf32> -> vector<5x160xf32>
    %208 = arith.addf %203, %207 : vector<5x160xf32>
    %c0_215 = arith.constant 0 : index
    %c0_216 = arith.constant 0 : index
    %209 = vector.load %arg5[%c0_215, %c0_216] : memref<1x160xf32, #tpu.memory_space<vmem>>, vector<1x160xf32>
    %210 = vector.broadcast %209 : vector<1x160xf32> to vector<5x160xf32>
    %211 = arith.addf %208, %210 : vector<5x160xf32>
    %cst_217 = arith.constant 0.000000e+00 : f32
    %212 = vector.broadcast %cst_217 : f32 to vector<5x160xf32>
    %213 = arith.maximumf %211, %212 : vector<5x160xf32>
    %214 = arith.maximumf %182, %213 : vector<5x160xf32>
    %215 = vector.extract_strided_slice %214 {offsets = [0, 0], sizes = [5, 80], strides = [1, 1]} : vector<5x160xf32> to vector<5x80xf32>
    %216 = vector.extract_strided_slice %214 {offsets = [0, 80], sizes = [5, 80], strides = [1, 1]} : vector<5x160xf32> to vector<5x80xf32>
    %217 = arith.maximumf %215, %216 : vector<5x80xf32>
    %cst_218 = arith.constant 0.000000e+00 : f32
    %218 = vector.broadcast %cst_218 : f32 to vector<1x128xf32>
    %219 = vector.extract_strided_slice %217 {offsets = [0, 0], sizes = [1, 80], strides = [1, 1]} : vector<5x80xf32> to vector<1x80xf32>
    %c0_219 = arith.constant 0 : index
    %c0_220 = arith.constant 0 : index
    %c0_221 = arith.constant 0 : index
    %220 = vector.load %arg6[%c0_219, %c0_220, %c0_221] : memref<5x80x128xf32, #tpu.memory_space<vmem>>, vector<1x80x128xf32>
    %221 = vector.shape_cast %220 : vector<1x80x128xf32> to vector<80x128xf32>
    %cst_222 = arith.constant dense<0.000000e+00> : vector<1x128xf32>
    %222 = tpu.matmul %219, %221, %cst_222 {dimension_numbers = #tpu.dot_dimension_numbers<[1], [0], [0], [1], [0, 0, 1, 1], [], []>} : vector<1x80xf32>, vector<80x128xf32>, vector<1x128xf32> -> vector<1x128xf32>
    %223 = arith.addf %218, %222 : vector<1x128xf32>
    %224 = vector.extract_strided_slice %217 {offsets = [1, 0], sizes = [1, 80], strides = [1, 1]} : vector<5x80xf32> to vector<1x80xf32>
    %c1_223 = arith.constant 1 : index
    %c0_224 = arith.constant 0 : index
    %c0_225 = arith.constant 0 : index
    %225 = vector.load %arg6[%c1_223, %c0_224, %c0_225] : memref<5x80x128xf32, #tpu.memory_space<vmem>>, vector<1x80x128xf32>
    %226 = vector.shape_cast %225 : vector<1x80x128xf32> to vector<80x128xf32>
    %cst_226 = arith.constant dense<0.000000e+00> : vector<1x128xf32>
    %227 = tpu.matmul %224, %226, %cst_226 {dimension_numbers = #tpu.dot_dimension_numbers<[1], [0], [0], [1], [0, 0, 1, 1], [], []>} : vector<1x80xf32>, vector<80x128xf32>, vector<1x128xf32> -> vector<1x128xf32>
    %228 = arith.addf %223, %227 : vector<1x128xf32>
    %229 = vector.extract_strided_slice %217 {offsets = [2, 0], sizes = [1, 80], strides = [1, 1]} : vector<5x80xf32> to vector<1x80xf32>
    %c2_227 = arith.constant 2 : index
    %c0_228 = arith.constant 0 : index
    %c0_229 = arith.constant 0 : index
    %230 = vector.load %arg6[%c2_227, %c0_228, %c0_229] : memref<5x80x128xf32, #tpu.memory_space<vmem>>, vector<1x80x128xf32>
    %231 = vector.shape_cast %230 : vector<1x80x128xf32> to vector<80x128xf32>
    %cst_230 = arith.constant dense<0.000000e+00> : vector<1x128xf32>
    %232 = tpu.matmul %229, %231, %cst_230 {dimension_numbers = #tpu.dot_dimension_numbers<[1], [0], [0], [1], [0, 0, 1, 1], [], []>} : vector<1x80xf32>, vector<80x128xf32>, vector<1x128xf32> -> vector<1x128xf32>
    %233 = arith.addf %228, %232 : vector<1x128xf32>
    %234 = vector.extract_strided_slice %217 {offsets = [3, 0], sizes = [1, 80], strides = [1, 1]} : vector<5x80xf32> to vector<1x80xf32>
    %c3_231 = arith.constant 3 : index
    %c0_232 = arith.constant 0 : index
    %c0_233 = arith.constant 0 : index
    %235 = vector.load %arg6[%c3_231, %c0_232, %c0_233] : memref<5x80x128xf32, #tpu.memory_space<vmem>>, vector<1x80x128xf32>
    %236 = vector.shape_cast %235 : vector<1x80x128xf32> to vector<80x128xf32>
    %cst_234 = arith.constant dense<0.000000e+00> : vector<1x128xf32>
    %237 = tpu.matmul %234, %236, %cst_234 {dimension_numbers = #tpu.dot_dimension_numbers<[1], [0], [0], [1], [0, 0, 1, 1], [], []>} : vector<1x80xf32>, vector<80x128xf32>, vector<1x128xf32> -> vector<1x128xf32>
    %238 = arith.addf %233, %237 : vector<1x128xf32>
    %239 = vector.extract_strided_slice %217 {offsets = [4, 0], sizes = [1, 80], strides = [1, 1]} : vector<5x80xf32> to vector<1x80xf32>
    %c4_235 = arith.constant 4 : index
    %c0_236 = arith.constant 0 : index
    %c0_237 = arith.constant 0 : index
    %240 = vector.load %arg6[%c4_235, %c0_236, %c0_237] : memref<5x80x128xf32, #tpu.memory_space<vmem>>, vector<1x80x128xf32>
    %241 = vector.shape_cast %240 : vector<1x80x128xf32> to vector<80x128xf32>
    %cst_238 = arith.constant dense<0.000000e+00> : vector<1x128xf32>
    %242 = tpu.matmul %239, %241, %cst_238 {dimension_numbers = #tpu.dot_dimension_numbers<[1], [0], [0], [1], [0, 0, 1, 1], [], []>} : vector<1x80xf32>, vector<80x128xf32>, vector<1x128xf32> -> vector<1x128xf32>
    %243 = arith.addf %238, %242 : vector<1x128xf32>
    %c0_239 = arith.constant 0 : index
    %c0_240 = arith.constant 0 : index
    %244 = vector.load %arg7[%c0_239, %c0_240] : memref<1x128xf32, #tpu.memory_space<vmem>>, vector<1x128xf32>
    %245 = arith.addf %243, %244 : vector<1x128xf32>
    %cst_241 = arith.constant 0.000000e+00 : f32
    %246 = vector.broadcast %cst_241 : f32 to vector<1x128xf32>
    %247 = arith.maximumf %245, %246 : vector<1x128xf32>
    %c0_242 = arith.constant 0 : index
    %c0_243 = arith.constant 0 : index
    %248 = vector.load %arg8[%c0_242, %c0_243] : memref<128x128xf32, #tpu.memory_space<vmem>>, vector<128x128xf32>
    %cst_244 = arith.constant dense<0.000000e+00> : vector<1x128xf32>
    %249 = tpu.matmul %247, %248, %cst_244 {dimension_numbers = #tpu.dot_dimension_numbers<[1], [0], [0], [1], [0, 0, 1, 1], [], []>} : vector<1x128xf32>, vector<128x128xf32>, vector<1x128xf32> -> vector<1x128xf32>
    %c0_245 = arith.constant 0 : index
    %c0_246 = arith.constant 0 : index
    %250 = vector.load %arg9[%c0_245, %c0_246] : memref<1x128xf32, #tpu.memory_space<vmem>>, vector<1x128xf32>
    %251 = arith.addf %249, %250 : vector<1x128xf32>
    %cst_247 = arith.constant 0.000000e+00 : f32
    %252 = vector.broadcast %cst_247 : f32 to vector<1x128xf32>
    %253 = arith.maximumf %251, %252 : vector<1x128xf32>
    %c0_248 = arith.constant 0 : index
    %c0_249 = arith.constant 0 : index
    %254 = vector.load %arg10[%c0_248, %c0_249] : memref<128x128xf32, #tpu.memory_space<vmem>>, vector<128x128xf32>
    %cst_250 = arith.constant dense<0.000000e+00> : vector<1x128xf32>
    %255 = tpu.matmul %253, %254, %cst_250 {dimension_numbers = #tpu.dot_dimension_numbers<[1], [0], [0], [1], [0, 0, 1, 1], [], []>} : vector<1x128xf32>, vector<128x128xf32>, vector<1x128xf32> -> vector<1x128xf32>
    %c0_251 = arith.constant 0 : index
    %c0_252 = arith.constant 0 : index
    %256 = vector.load %arg11[%c0_251, %c0_252] : memref<1x128xf32, #tpu.memory_space<vmem>>, vector<1x128xf32>
    %257 = arith.addf %255, %256 : vector<1x128xf32>
    %c0_253 = arith.constant 0 : index
    %c0_254 = arith.constant 0 : index
    %c0_255 = arith.constant 0 : index
    %258 = vector.load %arg12[%c0_253, %c0_254, %c0_255] : memref<1x1x128xf32, #tpu.memory_space<vmem>>, vector<1x1x128xf32>
    %259 = vector.shape_cast %258 : vector<1x1x128xf32> to vector<1x128xf32>
    %260 = vector.shape_cast %257 : vector<1x128xf32> to vector<1x1x128xf32>
    tpu.vector_store %arg12[%c0_253, %c0_254, %c0_255], %260 {strides = array<i32>} : memref<1x1x128xf32, #tpu.memory_space<vmem>>, vector<1x1x128xf32>,
    return
  }
  func.func @transform_0(%arg0: i32) -> (i32, i32, i32, i32) {
    %c0_i32 = arith.constant 0 : i32
    %c0_i32_0 = arith.constant 0 : i32
    %c0_i32_1 = arith.constant 0 : i32
    %c0_i32_2 = arith.constant 0 : i32
    return %arg0, %c0_i32, %c0_i32_0, %c0_i32_1 : i32, i32, i32, i32
  }
  func.func @transform_1(%arg0: i32) -> (i32, i32, i32) {
    %c0_i32 = arith.constant 0 : i32
    %c0_i32_0 = arith.constant 0 : i32
    %c0_i32_1 = arith.constant 0 : i32
    %c0_i32_2 = arith.constant 0 : i32
    return %c0_i32, %c0_i32_0, %c0_i32_1 : i32, i32, i32
  }
  func.func @transform_2(%arg0: i32) -> (i32, i32) {
    %c0_i32 = arith.constant 0 : i32
    %c0_i32_0 = arith.constant 0 : i32
    %c0_i32_1 = arith.constant 0 : i32
    return %c0_i32, %c0_i32_0 : i32, i32
  }
  func.func @transform_3(%arg0: i32) -> (i32, i32, i32) {
    %c0_i32 = arith.constant 0 : i32
    %c0_i32_0 = arith.constant 0 : i32
    %c0_i32_1 = arith.constant 0 : i32
    %c0_i32_2 = arith.constant 0 : i32
    return %c0_i32, %c0_i32_0, %c0_i32_1 : i32, i32, i32
  }
  func.func @transform_4(%arg0: i32) -> (i32, i32) {
    %c0_i32 = arith.constant 0 : i32
    %c0_i32_0 = arith.constant 0 : i32
    %c0_i32_1 = arith.constant 0 : i32
    return %c0_i32, %c0_i32_0 : i32, i32
  }
  func.func @transform_5(%arg0: i32) -> (i32, i32, i32) {
    %c0_i32 = arith.constant 0 : i32
    %c0_i32_0 = arith.constant 0 : i32
    %c0_i32_1 = arith.constant 0 : i32
    %c0_i32_2 = arith.constant 0 : i32
    return %c0_i32, %c0_i32_0, %c0_i32_1 : i32, i32, i32
  }
  func.func @transform_6(%arg0: i32) -> (i32, i32) {
    %c0_i32 = arith.constant 0 : i32
    %c0_i32_0 = arith.constant 0 : i32
    %c0_i32_1 = arith.constant 0 : i32
    return %c0_i32, %c0_i32_0 : i32, i32
  }
  func.func @transform_7(%arg0: i32) -> (i32, i32) {
    %c0_i32 = arith.constant 0 : i32
    %c0_i32_0 = arith.constant 0 : i32
    %c0_i32_1 = arith.constant 0 : i32
    return %c0_i32, %c0_i32_0 : i32, i32
  }
  func.func @transform_8(%arg0: i32) -> (i32, i32) {
    %c0_i32 = arith.constant 0 : i32
    %c0_i32_0 = arith.constant 0 : i32
    %c0_i32_1 = arith.constant 0 : i32
    return %c0_i32, %c0_i32_0 : i32, i32
  }
  func.func @transform_9(%arg0: i32) -> (i32, i32) {
    %c0_i32 = arith.constant 0 : i32
    %c0_i32_0 = arith.constant 0 : i32
    %c0_i32_1 = arith.constant 0 : i32
    return %c0_i32, %c0_i32_0 : i32, i32
  }
  func.func @transform_10(%arg0: i32) -> (i32, i32) {
    %c0_i32 = arith.constant 0 : i32
    %c0_i32_0 = arith.constant 0 : i32
    %c0_i32_1 = arith.constant 0 : i32
    return %c0_i32, %c0_i32_0 : i32, i32
  }
  func.func @transform_11(%arg0: i32) -> (i32, i32, i32) {
    %c0_i32 = arith.constant 0 : i32
    %c0_i32_0 = arith.constant 0 : i32
    %c0_i32_1 = arith.constant 0 : i32
    return %arg0, %c0_i32, %c0_i32_0 : i32, i32, i32
  }
}

</mosaic_0001>

<bundles_post_ra>
// kernel: tile.13
= control target key start
LH: loop header
LB: loop body
LE: loop exit
PB: predicated region body
PF: predicated region fallthrough
CT: control target
= control target key end

     0   :  { %s40_s0 = inlined_call_operand.vmem [shape: f32[6], index: 0, kind: input, shape index: {}]   ;;  %s41_s1 = inlined_call_operand.vmem [shape: f32[28,6], index: 1, kind: output, shape index: {}]  }
   0x1   :  { %v4_v0 = vld [vmem:[%s40_s0] ss:$0 sm:$0xff] }
   0x2   :  { %5 = vst [vmem:[%s41_s1] sm:$0xff] %v4_v0 }
   0x3   :  { %12 = vst [vmem:[%s41_s1 + $0x8] sm:$0xff] %v4_v0 }
   0x4   :  { %13 = vst [vmem:[%s41_s1 + $0x10] sm:$0xff] %v4_v0 }
   0x5   :  { %14 = vst [vmem:[%s41_s1 + $0x18] sm:$0xff] %v4_v0 }

// kernel: tile.14
= control target key start
LH: loop header
LB: loop body
LE: loop exit
PB: predicated region body
PF: predicated region fallthrough
CT: control target
= control target key end

     0   :  { %vm9_vm0 = vcmask 15360   ;;  %s248_s12 = smov 126   ;;  %s249_s13 = smov 114   ;;  %vm3_vm1 = vcmask 48128   ;;  %vm13_vm2 = vcmask 31744   ;;  %vm16_vm3 = vcmask 1048560   ;;  %s378_s0 = inlined_call_operand.vmem [shape: f32[28,6], index: 0, kind: input, shape index: {}]   ;;  %s379_s1 = inlined_call_operand.vmem [shape: f32[1,168], index: 1, kind: output, shape index: {}]  }
   0x1   :  { %v192_v0 = vld [vmem:[%s378_s0 + $0x15] sm:$0x1]   ;;  %v195_v3 = vld [vmem:[%s378_s0 + $0x13] sm:$0x1]   ;;  %v197_v4 = vld [vmem:[%s378_s0 + $0x11] sm:$0x1]  }
   0x2   :  { %v193_v1 = vld [vmem:[%s378_s0 + $0x15] sm:$0x1]   ;;  %26 = vrot.lane.b32.xlu1 %v195_v3, %s249_s13  ;;  %s250_s16 = smov 102   ;;  %v194_v5 = vld [vmem:[%s378_s0 + $0x14] sm:$0x1]   ;;  %s251_s21 = smov 120  }
   0x3   :  { %v10_v2 = vsel %vm9_vm0, %v193_v1, %v192_v0  ;;  %38 = vrot.lane.b32.xlu2 %v197_v4, %s250_s16  ;;  %v196_v6 = vld [vmem:[%s378_s0 + $0x12] sm:$0x1]   ;;  %s252_s22 = smov 108   ;;  %v198_v7 = vld [vmem:[%s378_s0 + $0x10] sm:$0x1]   ;;  %s253_s25 = smov 96  }
   0x4   :  { %11 = vrot.lane.b32.xlu0 %v10_v2, %s248_s12  ;;  %v199_v8 = vld [vmem:[%s378_s0 + $0xf] sm:$0x1]   ;;  %v200_v9 = vld [vmem:[%s378_s0 + $0xe] sm:$0x1]   ;;  %s254_s30 = smov 90   ;;  %s255_s2 = smov 84  }
   0x5   :  { %v201_v10 = vld [vmem:[%s378_s0 + $0xd] sm:$0x1]   ;;  %s256_s5 = smov 78   ;;  %v202_v11 = vld [vmem:[%s378_s0 + $0xc] sm:$0x1]   ;;  %s257_s10 = smov 72  }
   0x6   :  { %v203_v12 = vld [vmem:[%s378_s0 + $0xb] sm:$0x1]   ;;  %s258_s11 = smov 66   ;;  %v204_v13 = vld [vmem:[%s378_s0 + $0xa] sm:$0x1]   ;;  %s259_s14 = smov 60  }
   0x7   :  { %v205_v14 = vld [vmem:[%s378_s0 + $0x9] sm:$0x1]   ;;  %v206_v15 = vld [vmem:[%s378_s0 + $0x8] sm:$0x1]   ;;  %s260_s19 = smov 54   ;;  %s261_s20 = smov 48  }
   0x8   :  { %v207_v16 = vld [vmem:[%s378_s0 + $0x7] sm:$0x1]   ;;  %s262_s23 = smov 42   ;;  %v208_v17 = vld [vmem:[%s378_s0 + $0x6] sm:$0x1]   ;;  %s263_s28 = smov 36  }
   0x9   :  { %v209_v18 = vld [vmem:[%s378_s0 + $0x1b] sm:$0x1]   ;;  %s264_s29 = smov 34   ;;  %v210_v19 = vld [vmem:[%s378_s0 + $0x5] sm:$0x1]   ;;  %s265_s3 = smov 30  }
   0xa   :  { %32 = vrot.lane.b32.xlu1 %v196_v6, %s252_s22  ;;  %v211_v20 = vld [vmem:[%s378_s0 + $0x1a] sm:$0x1]   ;;  %v212_v21 = vld [vmem:[%s378_s0 + $0x4] sm:$0x1]   ;;  %s266_s8 = smov 28   ;;  %s267_s9 = smov 24  }
   0xb   :  { %44 = vrot.lane.b32.xlu2 %v198_v7, %s253_s25  ;;  %v213_v22 = vld [vmem:[%s378_s0 + $0x19] sm:$0x1]   ;;  %s268_s12 = smov 22   ;;  %v214_v23 = vld [vmem:[%s378_s0 + $0x3] sm:$0x1]   ;;  %s269_s17 = smov 18  }
   0xc   :  { %20 = vrot.lane.b32.xlu0 %v194_v5, %s251_s21  ;;  %v215_v24 = vld [vmem:[%s378_s0 + $0x18] sm:$0x1]   ;;  %s270_s18 = smov 16   ;;  %v216_v25 = vld [vmem:[%s378_s0 + $0x2] sm:$0x1]   ;;  %s271_s21 = smov 12  }
   0xd   :  { %v217_v26 = vld [vmem:[%s378_s0 + $0x17] sm:$0x1]   ;;  %v218_v27 = vld [vmem:[%s378_s0 + $0x1] sm:$0x1]   ;;  %s272_s26 = smov 10   ;;  %s273_s27 = smov 6  }
   0xe   :  { %v219_v28 = vld [vmem:[%s378_s0 + $0x16] sm:$0x1]   ;;  %v2_v29 = vld [vmem:[%s378_s0] sm:$0x1]   ;;  %vm22_vm4 = vcmask 1032128   ;;  %vm28_vm5 = vcmask 982928  }
   0xf   :  { %4 = vst.msk [vmem:[#allocation0] sm:$0x1] %vm3_vm1, %v2_v29   ;;  %vm34_vm6 = vcmask 933728   ;;  %vm40_vm7 = vcmask 884528   ;;  %vm46_vm8 = vcmask 835328   ;;  %vm52_vm9 = vcmask 786128  }
  0x10   :  { %vm58_vm10 = vcmask 736928   ;;  %vm64_vm11 = vcmask 687728   ;;  %vm70_vm12 = vcmask 638528   ;;  %vm76_vm13 = vcmask 589328  }
  0x11   :  { %vm82_vm14 = vcmask 540128   ;;  %vm88_vm15 = vcmask 490928   ;;  %vm94_vm0 = vcmask 441728   ;;  %vm100_vm1 = vcmask 392528  }
  0x12   :  { %56 = vrot.lane.b32.xlu1 %v200_v9, %s255_s2 }
  0x13   :  { %62 = vrot.lane.b32.xlu2 %v201_v10, %s256_s5 }
  0x14   :  { %50 = vrot.lane.b32.xlu0 %v199_v8, %s254_s30  ;;  %s274_s30 = smov 4  }
  0x1a   :  { %74 = vrot.lane.b32.xlu1 %v203_v12, %s258_s11 }
  0x1b   :  { %80 = vrot.lane.b32.xlu2 %v204_v13, %s259_s14 }
  0x1c   :  { %68 = vrot.lane.b32.xlu0 %v202_v11, %s257_s10 }
  0x22   :  { %92 = vrot.lane.b32.xlu1 %v206_v15, %s261_s20 }
  0x23   :  { %98 = vrot.lane.b32.xlu2 %v207_v16, %s262_s23 }
  0x24   :  { %86 = vrot.lane.b32.xlu0 %v205_v14, %s260_s19 }
  0x2a   :  { %110 = vrot.lane.b32.xlu1 %v209_v18, %s264_s29 }
  0x2b   :  { %117 = vrot.lane.b32.xlu2 %v210_v19, %s265_s3 }
  0x2c   :  { %104 = vrot.lane.b32.xlu0 %v208_v17, %s263_s28 }
  0x32   :  { %130 = vrot.lane.b32.xlu1 %v212_v21, %s267_s9 }
  0x33   :  { %136 = vrot.lane.b32.xlu2 %v213_v22, %s268_s12 }
  0x34   :  { %123 = vrot.lane.b32.xlu0 %v211_v20, %s266_s8 }
  0x3a   :  { %149 = vrot.lane.b32.xlu1 %v215_v24, %s270_s18 }
  0x3b   :  { %156 = vrot.lane.b32.xlu2 %v216_v25, %s271_s21 }
  0x3c   :  { %143 = vrot.lane.b32.xlu0 %v214_v23, %s269_s17 }
  0x42   :  { %169 = vrot.lane.b32.xlu1 %v218_v27, %s273_s27 }
  0x43   :  { %175 = vrot.lane.b32.xlu2 %v219_v28, %s274_s30 }
  0x44   :  { %162 = vrot.lane.b32.xlu0 %v217_v26, %s272_s26 }
  0x5d   :  { %v39_v30 = vpop.permute.xlu2 %38  }
  0x65   :  { %v45_v31 = vpop.permute.xlu2 %44  }
  0x6d   :  { %v63_v32 = vpop.permute.xlu2 %62  }
  0x74   :  { %v27_v34 = vpop.permute.xlu1 %26  }
  0x75   :  { %v81_v35 = vpop.permute.xlu2 %80  }
  0x76   :  { %v12_v33 = vpop.permute.xlu0 %11  }
  0x77   :  { %15 = vst.msk [vmem:[#allocation0 + $0x8] sm:$0x1] %vm13_vm2, %v12_v33   ;;  %vm106_vm2 = vcmask 343328  }
  0x78   :  { %17 = vst.msk [vmem:[#allocation0] sm:$0x1] %vm16_vm3, %v12_v33   ;;  %vm119_vm3 = vcmask 294128  }
  0x7c   :  { %v33_v37 = vpop.permute.xlu1 %32  }
  0x7d   :  { %v99_v38 = vpop.permute.xlu2 %98  }
  0x7e   :  { %v21_v36 = vpop.permute.xlu0 %20  }
  0x7f   :  { %23 = vst.msk [vmem:[#allocation0] sm:$0x1] %vm22_vm4, %v21_v36   ;;  %vm112_vm4 = vcmask 326928  }
  0x80   :  { %29 = vst.msk [vmem:[#allocation0] sm:$0x1] %vm28_vm5, %v27_v34   ;;  %vm125_vm5 = vcmask 277728  }
  0x81   :  { %35 = vst.msk [vmem:[#allocation0] sm:$0x1] %vm34_vm6, %v33_v37   ;;  %vm138_vm6 = vcmask 228528  }
  0x82   :  { %41 = vst.msk [vmem:[#allocation0] sm:$0x1] %vm40_vm7, %v39_v30   ;;  %vm132_vm7 = vcmask 244928  }
  0x83   :  { %47 = vst.msk [vmem:[#allocation0] sm:$0x1] %vm46_vm8, %v45_v31   ;;  %vm145_vm8 = vcmask 195728  }
  0x84   :  { %v57_v40 = vpop.permute.xlu1 %56  }
  0x85   :  { %v118_v41 = vpop.permute.xlu2 %117  }
  0x86   :  { %v51_v39 = vpop.permute.xlu0 %50  }
  0x87   :  { %53 = vst.msk [vmem:[#allocation0] sm:$0x1] %vm52_vm9, %v51_v39   ;;  %vm158_vm9 = vcmask 146528  }
  0x88   :  { %59 = vst.msk [vmem:[#allocation0] sm:$0x1] %vm58_vm10, %v57_v40   ;;  %vm151_vm10 = vcmask 179328  }
  0x89   :  { %65 = vst.msk [vmem:[#allocation0] sm:$0x1] %vm64_vm11, %v63_v32   ;;  %vm164_vm11 = vcmask 130128  }
  0x8c   :  { %v75_v43 = vpop.permute.xlu1 %74  }
  0x8d   :  { %v137_v44 = vpop.permute.xlu2 %136  }
  0x8e   :  { %v69_v42 = vpop.permute.xlu0 %68  }
  0x8f   :  { %71 = vst.msk [vmem:[#allocation0] sm:$0x1] %vm70_vm12, %v69_v42   ;;  %vm177_vm12 = vcmask 80928  }
  0x90   :  { %77 = vst.msk [vmem:[#allocation0] sm:$0x1] %vm76_vm13, %v75_v43   ;;  %vm171_vm13 = vcmask 97328  }
  0x91   :  { %83 = vst.msk [vmem:[#allocation0] sm:$0x1] %vm82_vm14, %v81_v35  }
  0x94   :  { %v93_v46 = vpop.permute.xlu1 %92  }
  0x95   :  { %v157_v47 = vpop.permute.xlu2 %156  }
  0x96   :  { %v87_v45 = vpop.permute.xlu0 %86  }
  0x97   :  { %89 = vst.msk [vmem:[#allocation0] sm:$0x1] %vm88_vm15, %v87_v45  }
  0x98   :  { %95 = vst.msk [vmem:[#allocation0] sm:$0x1] %vm94_vm0, %v93_v46  }
  0x99   :  { %101 = vst.msk [vmem:[#allocation0] sm:$0x1] %vm100_vm1, %v99_v38  }
  0x9c   :  { %v111_v49 = vpop.permute.xlu1 %110  }
  0x9d   :  { %114 = vst.msk [vmem:[#allocation0 + $0x8] sm:$0x1] %vm112_vm4, %v111_v49   ;;  %v176_v50 = vpop.permute.xlu2 %175  }
  0x9e   :  { %v105_v48 = vpop.permute.xlu0 %104  }
  0x9f   :  { %107 = vst.msk [vmem:[#allocation0] sm:$0x1] %vm106_vm2, %v105_v48  }
  0xa0   :  { %120 = vst.msk [vmem:[#allocation0] sm:$0x1] %vm119_vm3, %v118_v41  }
  0xa4   :  { %v131_v52 = vpop.permute.xlu1 %130  }
  0xa5   :  { %133 = vst.msk [vmem:[#allocation0] sm:$0x1] %vm132_vm7, %v131_v52  }
  0xa6   :  { %v124_v51 = vpop.permute.xlu0 %123  }
  0xa7   :  { %127 = vst.msk [vmem:[#allocation0 + $0x8] sm:$0x1] %vm125_vm5, %v124_v51  }
  0xa8   :  { %140 = vst.msk [vmem:[#allocation0 + $0x8] sm:$0x1] %vm138_vm6, %v137_v44  }
  0xac   :  { %v150_v54 = vpop.permute.xlu1 %149  }
  0xad   :  { %153 = vst.msk [vmem:[#allocation0 + $0x8] sm:$0x1] %vm151_vm10, %v150_v54  }
  0xae   :  { %v144_v53 = vpop.permute.xlu0 %143  }
  0xaf   :  { %146 = vst.msk [vmem:[#allocation0] sm:$0x1] %vm145_vm8, %v144_v53  }
  0xb0   :  { %159 = vst.msk [vmem:[#allocation0] sm:$0x1] %vm158_vm9, %v157_v47  }
  0xb4   :  { %v170_v56 = vpop.permute.xlu1 %169  }
  0xb5   :  { %172 = vst.msk [vmem:[#allocation0] sm:$0x1] %vm171_vm13, %v170_v56  }
  0xb6   :  { %v163_v55 = vpop.permute.xlu0 %162  }
  0xb7   :  { %166 = vst.msk [vmem:[#allocation0 + $0x8] sm:$0x1] %vm164_vm11, %v163_v55  }
  0xb8   :  { %179 = vst.msk [vmem:[#allocation0 + $0x8] sm:$0x1] %vm177_vm12, %v176_v50  }
  0xbc   :  { %v182_v58 = vld [vmem:[#allocation0] sm:$0x1] }
  0xbd   :  { %185 = vst [vmem:[%s379_s1] sm:$0x1] %v182_v58 }
  0xbf   :  { %v187_v57 = vld [vmem:[#allocation0 + $0x8] sm:$0x1] }
  0xc0   :  { %220 = vst [vmem:[%s379_s1 + $0x1] sm:$0x1] %v187_v57 }

// kernel: tile.18
= control target key start
LH: loop header
LB: loop body
LE: loop exit
PB: predicated region body
PF: predicated region fallthrough
CT: control target
= control target key end

     0   :  { %s28_s0 = inlined_call_operand.vmem [shape: f32[16], index: 0, kind: input, shape index: {}]   ;;  %s29_s1 = inlined_call_operand.vmem [shape: f32[10,16], index: 1, kind: output, shape index: {}]  }
   0x1   :  { %v4_v0 = vld [vmem:[%s28_s0] ss:$0 sm:$0xff] }
   0x2   :  { %5 = vst [vmem:[%s29_s1] sm:$0xff] %v4_v0 }
   0x3   :  { %8 = vst [vmem:[%s29_s1 + $0x8] sm:$0xff] %v4_v0 }

// kernel: tile.19
= control target key start
LH: loop header
LB: loop body
LE: loop exit
PB: predicated region body
PF: predicated region fallthrough
CT: control target
= control target key end

     0   :  { %s76_s10 = smov 112   ;;  %s77_s11 = smov 80   ;;  %vm4_vm0 = vcmask 130048   ;;  %vm10_vm1 = vcmask 1048448   ;;  %vm16_vm2 = vcmask 917248   ;;  %vm22_vm3 = vcmask 786048   ;;  %s123_s0 = inlined_call_operand.vmem [shape: f32[10,16], index: 0, kind: input, shape index: {}]   ;;  %s124_s1 = inlined_call_operand.vmem [shape: f32[1,160], index: 1, kind: output, shape index: {}]  }
   0x1   :  { %v61_v0 = vld [vmem:[%s123_s0 + $0x7] sm:$0x1]   ;;  %v63_v1 = vld [vmem:[%s123_s0 + $0x5] sm:$0x1]   ;;  %v65_v2 = vld [vmem:[%s123_s0 + $0x3] sm:$0x1]  }
   0x2   :  { %8 = vrot.lane.b32.xlu0 %v61_v0, %s76_s10  ;;  %20 = vrot.lane.b32.xlu1 %v63_v1, %s77_s11  ;;  %s78_s14 = smov 48   ;;  %v62_v3 = vld [vmem:[%s123_s0 + $0x6] sm:$0x1]   ;;  %v64_v4 = vld [vmem:[%s123_s0 + $0x4] sm:$0x1]   ;;  %s79_s19 = smov 96  }
   0x3   :  { %32 = vrot.lane.b32.xlu2 %v65_v2, %s78_s14  ;;  %s80_s20 = smov 64   ;;  %v66_v5 = vld [vmem:[%s123_s0 + $0x2] sm:$0x1]   ;;  %s43_s23 = smov 3  ;;  %vm28_vm4 = vcmask 654848   ;;  %vm34_vm5 = vcmask 523648  }
   0x4   :  { %s81_s24 = smov 32   ;;  %v67_v6 = vld [vmem:[%s123_s0 + $0x1] ss:$8 sm:%s43_s23]   ;;  %s82_s27 = smov 16   ;;  %vm40_vm6 = vcmask 392448   ;;  %vm47_vm7 = vcmask 261248  }
   0x5   :  { %s2_s28 = smov 3 }
   0x6   :  { %v3_v7 = vld [vmem:[%s123_s0] ss:$8 sm:%s2_s28]  }
   0x7   :  { %5 = vst.msk [vmem:[#allocation0] ss:$8 sm:$0x3] %vm4_vm0, %v3_v7  }
   0xa   :  { %14 = vrot.lane.b32.xlu0 %v62_v3, %s79_s19  ;;  %26 = vrot.lane.b32.xlu1 %v64_v4, %s80_s20 }
   0xb   :  { %38 = vrot.lane.b32.xlu2 %v66_v5, %s81_s24 }
  0x12   :  { %45 = vrot.lane.b32.xlu0 %v67_v6, %s82_s27 }
  0x5d   :  { %v33_v8 = vpop.permute.xlu2 %32  }
  0x65   :  { %v39_v9 = vpop.permute.xlu2 %38  }
  0x74   :  { %v9_v10 = vpop.permute.xlu0 %8   ;;  %v21_v11 = vpop.permute.xlu1 %20  }
  0x75   :  { %11 = vst.msk [vmem:[#allocation0] sm:$0x1] %vm10_vm1, %v9_v10  }
  0x7c   :  { %v15_v12 = vpop.permute.xlu0 %14   ;;  %v27_v13 = vpop.permute.xlu1 %26  }
  0x7d   :  { %17 = vst.msk [vmem:[#allocation0] sm:$0x1] %vm16_vm2, %v15_v12  }
  0x7e   :  { %23 = vst.msk [vmem:[#allocation0] sm:$0x1] %vm22_vm3, %v21_v11  }
  0x7f   :  { %29 = vst.msk [vmem:[#allocation0] sm:$0x1] %vm28_vm4, %v27_v13  }
  0x80   :  { %35 = vst.msk [vmem:[#allocation0] sm:$0x1] %vm34_vm5, %v33_v8  }
  0x81   :  { %41 = vst.msk [vmem:[#allocation0] sm:$0x1] %vm40_vm6, %v39_v9  }
  0x84   :  { %v46_v14 = vpop.permute.xlu0 %45  }
  0x85   :  { %48 = vst.msk [vmem:[#allocation0] ss:$8 sm:$0x3] %vm47_vm7, %v46_v14  }
  0x8c   :  { %v51_v15 = vld [vmem:[#allocation0] sm:$0x1]  ;;  %v56_v16 = vld [vmem:[#allocation0 + $0x8] sm:$0x1] }
  0x8d   :  { %54 = vst [vmem:[%s124_s1] sm:$0x1] %v51_v15 }
  0x8e   :  { %68 = vst [vmem:[%s124_s1 + $0x1] sm:$0x1] %v56_v16 }

// kernel: lenet5_forward.1
= control target key start
LH: loop header
LB: loop body
LE: loop exit
PB: predicated region body
PF: predicated region fallthrough
CT: control target
= control target key end

     0   :  { %s4340_s0 = inlined_call_operand.vmem [shape: f32[2,4,8,32], index: 0, kind: input, shape index: {}]   ;;  %s4341_s1 = inlined_call_operand.vmem [shape: f32[5,32,168], index: 1, kind: input, shape index: {}]   ;;  %s4342_s2 = inlined_call_operand.vmem [shape: f32[1,168], index: 2, kind: input, shape index: {}]   ;;  %s4343_s3 = inlined_call_operand.vmem [shape: f32[5,84,160], index: 3, kind: input, shape index: {}]   ;;  %s4344_s4 = inlined_call_operand.vmem [shape: f32[1,160], index: 4, kind: input, shape index: {}]   ;;  %s4345_s5 = inlined_call_operand.vmem [shape: f32[5,80,128], index: 5, kind: input, shape index: {}]   ;;  %s4346_s6 = inlined_call_operand.vmem [shape: f32[1,128], index: 6, kind: input, shape index: {}]   ;;  %s4347_s7 = inlined_call_operand.vmem [shape: f32[128,128], index: 7, kind: input, shape index: {}]   ;;  %s4348_s8 = inlined_call_operand.vmem [shape: f32[1,128], index: 8, kind: input, shape index: {}]   ;;  %s4349_s9 = inlined_call_operand.vmem [shape: f32[128,128], index: 9, kind: input, shape index: {}]   ;;  %s4350_s10 = inlined_call_operand.vmem [shape: f32[1,128], index: 10, kind: input, shape index: {}]   ;;  %s4351_s11 = inlined_call_operand.hbm [shape: f32[2,1,128], index: 11, kind: output, shape index: {}]  }
   0x1   :  { %4370 = sst [smem:[#allocation23_spill]] %s4340_s0 }
   0x2   :  { %4371 = sst [smem:[#allocation24_spill]] %s4341_s1 }
   0x3   :  { %16 = vsyncpa [#allocation3], 0 }
   0x4   :  { %18 = vsyncpa [#allocation3 + $0x1], 0  ;;  %s2682_s17 = smov 0   ;;  %s2684_s18 = smov 0  }
   0x5   :  { %s2686_s19 = smov 0   ;;  %s2688_s20 = smov 0  }
   0x6 LB: > { %s2703_s21 = sadd.s32 4294967295, %s2618_s20   ;;  %s2255_s22 = sadd.s32 4294967294, %s2618_s20   ;;  %s2618_s20 = sphi %s2688_s20, %s4415_s20   ;;  %s2614_s19 = sphi %s2686_s19, %s4414_s19   ;;  %s2610_s18 = sphi %s2684_s18, %s4413_s18   ;;  %s2606_s17 = sphi %s2682_s17, %s4412_s17  }
   0x7   : > { %s2707_s23 = sadd.s32 1, %s2618_s20   ;;  %s267_s24 = sadd.s32 1, %s2614_s19 }
   0x8   : > { %s264_s25 = ssub.s32 %s2618_s20, %s2707_s23  ;;  %p277_p0 = scmp.ne.s32.totalorder %s2614_s19, %s2610_s18 }
   0x9   : > { %p265_p1 = scmp.eq.s32.totalorder %s264_s25, 0  ;;  %p278_p2 = scmp.eq.s32.totalorder %s2703_s21, 1 }
   0xa   : > { %p283_p3 = scmp.ne.s32.totalorder %s2610_s18, %s2606_s17  ;;  %p284_p4 = scmp.eq.s32.totalorder %s2255_s22, 1 }
   0xb   : > { %s2718_s26 = scalar_select %p265_p1, %s2614_s19, %s267_s24  }
   0xc   : > { %p2720_p5 = por %p278_p2, %p277_p0  ;;  %p2724_p6 = por %p284_p4, %p283_p3 }
   0xd   : > { %p2258_p7 = scmp.ge.s32.totalorder %s2618_s20, 1  ;;  %p340_p8 = scmp.lt.s32.totalorder %s2618_s20, 3 }
   0xf   : > { %p341_p9 = pnand %p2258_p7, %p340_p8 }
  0x11   : > { %344 = sbr.rel (%p341_p9) target bundleno = 1111 (0x457), region = 64 }
  0x16   : > { %s4374_s1 = sld [smem:[#allocation24_spill]]  ;;  %p379_p10 = scmp.lt.s32.totalorder %s2703_s21, 1  ;;  %vm404_vm0 = vcmask 261120   ;;  %vm1382_vm1 = vcmask 1043456   ;;  %vm890_vm2 = vcmask 359424   ;;  %vm1378_vm3 = vcmask 687104  }
  0x17   : > { %s4375_s0 = sld [smem:[#allocation23_spill]]  ;;  %s2620_s12 = smov 44   ;;  %vm1931_vm4 = vcmask 392192   ;;  %vm1958_vm5 = vcmask 654336  }
  0x18   : > { %s380_s24 = scalar_select %p379_p10, %s2703_s21, 1 }
  0x19   : > { %s377_s16 = sand.u32 1, %s2610_s18   ;;  %s2196_s29 = scalar_lea.hbm %s4351_s11, %s2703_s21 }
  0x1a   : > { %s2514_s22 = sshll.u32 %s380_s24, 5  ;;  %s378_s30 = scalar_lea.vmem [#allocation2], %s377_s16 }
  0x1b   : > { %s2198_s13 = sshll.u32 %s378_s30, 4  ;;  %s2188_s14 = scalar_lea.sflag [#allocation3], %s377_s16  ;;  %s2199_s13 = int_to_ptr.vmem [resolvable:$true] %s2198_s13 }
  0x1c   : > { %v2733_v0 = vld [vmem:[%s4374_s1 + $0x70] sm:$0xff]  ;;  %v2738_v1 = vld [vmem:[%s4374_s1 + $0x78] sm:$0xff]  ;;  %v2751_v3 = vld [vmem:[%s4374_s1 + $0x60] sm:$0xff]  ;;  %s2576_s25 = scalar_lea.hbm %s4351_s11, 2 }
  0x1d   : > { %v2743_v2 = vld [vmem:[%s4374_s1 + $0x38] sm:$0xff]  ;;  %420 = vmatpush.msra.mxu0 %v2733_v0  ;;  %440 = vmatpush.msra.mxu1 %v2738_v1  ;;  %v2756_v4 = vld [vmem:[%s4374_s1 + $0x68] sm:$0xff]  ;;  %v2767_v6 = vld [vmem:[%s4374_s1 + $0xf0] sm:$0xff]  ;;  %s2819_s15 = scalar_lea.vmem %s4375_s0, %s2514_s22  ;;  %s2200_s0 = sshll.u32 %s2196_s29, 4  ;;  %s2201_s0 = int_to_ptr.hbm [resolvable:$true] %s2200_s0 }
  0x1e   : > { %v2761_v5 = vld [vmem:[%s4374_s1 + $0x28] sm:$0xff]  ;;  %483 = vmatpush.msra.mxu3 %v2743_v2  ;;  %v2772_v7 = vld [vmem:[%s4374_s1 + $0x50] sm:$0xff]  ;;  %v2777_v8 = vld [vmem:[%s4374_s1 + $0x58] sm:$0xff]  ;;  %573 = vmatpush.msra.mxu2 %v2767_v6  ;;  %s2570_s24 = sshra.s32 %s2201_s0, 4  ;;  %s2571_s24 = int_to_ptr.hbm [resolvable:$true] %s2570_s24 }
  0x1f   : > { %421 = vmatpush.msra.mxu0 %v2751_v3  ;;  %441 = vmatpush.msra.mxu1 %v2756_v4  ;;  %v2785_v9 = vld [vmem:[%s4374_s1 + $0x18] sm:$0xff]  ;;  %v2790_v10 = vld [vmem:[%s4374_s1 + $0xe0] sm:$0xff]  ;;  %v2802_v12 = vld [vmem:[%s4374_s1 + $0x48] sm:$0xff]  ;;  %p2577_p0 = scmp.lt.s32.totalorder %s2571_s24, %s4351_s11 }
  0x20   : > { %484 = vmatpush.msra.mxu3 %v2761_v5  ;;  %v2797_v11 = vld [vmem:[%s4374_s1 + $0x40] sm:$0xff]  ;;  %v2809_v13 = vld [vmem:[%s4374_s1 + $0x8] sm:$0xff]  ;;  %v2814_v14 = vld [vmem:[%s4374_s1 + $0xd0] sm:$0xff]  ;;  %574 = vmatpush.msra.mxu2 %v2790_v10 }
  0x21   : > { %422 = vmatpush.msra.mxu0 %v2772_v7  ;;  %442 = vmatpush.msra.mxu1 %v2777_v8  ;;  %v2824_v15 = vld [vmem:[%s2819_s15 + $0x8] sm:$0x7f]  ;;  %v384_v16 = vld [vmem:[%s2819_s15] sm:$0x7f]  ;;  %v2832_v17 = vld [vmem:[%s4374_s1 + $0x30] sm:$0xff] }
  0x22   : > { %485 = vmatpush.msra.mxu3 %v2785_v9  ;;  %575 = vmatpush.msra.mxu2 %v2814_v14  ;;  %v2839_v18 = vld [vmem:[%s4374_s1 + $0xb0] sm:$0xff]  ;;  %v2844_v19 = vld [vmem:[%s4374_s1 + $0xc0] sm:$0xff]  ;;  %v2851_v20 = vld [vmem:[%s2819_s15 + $0x18] sm:$0x7f] }
  0x23   : > { %423 = vmatpush.msra.mxu0 %v2797_v11  ;;  %443 = vmatpush.msra.mxu1 %v2802_v12  ;;  %v2856_v21 = vld [vmem:[%s4374_s1 + $0x20] sm:$0xff]  ;;  %v2868_v23 = vld [vmem:[%s4374_s1 + $0xf8] sm:$0xff]  ;;  %v2875_v24 = vld [vmem:[%s4374_s1 + $0x10] sm:$0xff] }
  0x24   : > { %486 = vmatpush.msra.mxu3 %v2809_v13  ;;  %2270 = vmatmul.msk.f32.vlgmr.msra.gmra.mxu0 %vm404_vm0, %v2824_v15  ;;  %v2863_v22 = vld [vmem:[%s4374_s1 + $0xa0] sm:$0xff]  ;;  %v2883_v25 = vld [vmem:[%s4374_s1 + $0x90] sm:$0xff]  ;;  %v2888_v26 = vld [vmem:[%s4374_s1 + $0xe8] sm:$0xff] }
  0x25   : > { %2271 = vmatmul.msk.f32.vlgmr.msra.gmra.mxu1 %vm404_vm0, %v2824_v15  ;;  %2273 = vmatmul.msk.f32.vlgmr.msra.gmra.mxu3 %vm404_vm0, %v384_v16  ;;  %v2895_v27 = vld [vmem:[%s4374_s1] sm:$0xff]  ;;  %v2907_v29 = vld [vmem:[%s4374_s1 + $0xd8] sm:$0xff]  ;;  %v2914_v30 = vld [vmem:[%s2819_s15 + $0x10] sm:$0x7f] }
  0x26   : > { %463 = vmatpush.msrb.mxu1 %v2832_v17  ;;  %517 = vmatpush.msrb.mxu0 %v2839_v18  ;;  %v2902_v28 = vld [vmem:[%s4374_s1 + $0x80] sm:$0xff]  ;;  %v2919_v31 = vld [vmem:[%s4374_s1 + $0xb8] sm:$0xff]  ;;  %v2926_v32 = vld [vmem:[%s4374_s1 + $0xc8] sm:$0xff] }
  0x27   : > { %576 = vmatpush.msra.mxu2 %v2844_v19  ;;  %593 = vmatpush.msrb.mxu3 %v2868_v23  ;;  %v2931_v33 = vld [vmem:[%s4374_s1 + $0x130] sm:$0xff]  ;;  %v2941_v34 = vld [vmem:[%s4374_s1 + $0xa8] sm:$0xff]  ;;  %v2948_v35 = vld [vmem:[%s4374_s1 + $0x120] sm:$0xff] }
  0x28   : > { %2294 = vmatmul.msk.f32.vlgmr.msra.gmra.mxu2 %vm404_vm0, %v2851_v20  ;;  %464 = vmatpush.msrb.mxu1 %v2856_v21  ;;  %v2956_v36 = vld [vmem:[%s4374_s1 + $0x98] sm:$0xff]  ;;  %v2964_v37 = vld [vmem:[%s4374_s1 + $0x110] sm:$0xff]  ;;  %v2971_v38 = vld [vmem:[%s4374_s1 + $0x88] sm:$0xff] }
  0x29   : > { %518 = vmatpush.msrb.mxu0 %v2863_v22  ;;  %680 = vmatpush.msrb.mxu2 %v2733_v0  ;;  %v2978_v39 = vld [vmem:[%s4374_s1 + $0x100] sm:$0xff]  ;;  %v2990_v41 = vld [vmem:[%s4374_s1 + $0x138] sm:$0xff]  ;;  %v3003_v42 = vld [vmem:[%s4374_s1 + $0x128] sm:$0xff] }
  0x2a   : > { %465 = vmatpush.msrb.mxu1 %v2875_v24  ;;  %594 = vmatpush.msrb.mxu3 %v2888_v26  ;;  %v2985_v40 = vld [vmem:[%s2819_s15 + $0x1] sm:$0x7f]  ;;  %v3013_v43 = vld [vmem:[%s4374_s1 + $0x118] sm:$0xff]  ;;  %v3023_v44 = vld [vmem:[%s4374_s1 + $0x108] sm:$0xff]  ;;  %s2572_s1 = scalar_lea.hbm %s2571_s24, 1 }
  0x2b   : > { %519 = vmatpush.msrb.mxu0 %v2883_v25  ;;  %681 = vmatpush.msrb.mxu2 %v2751_v3  ;;  %v3040_v45 = vld [vmem:[%s2819_s15 + $0x9] sm:$0x7f]  ;;  %v2325_v46 = vld [vmem:[%s2819_s15 + $0x11] sm:$0x7f]  ;;  %v2336_v47 = vld [vmem:[%s2819_s15 + $0x19] sm:$0x7f]  ;;  %p2573_p11 = scmp.ne.s32.totalorder %s2571_s24, %s2572_s1  ;;  %p2578_p1 = scmp.lt.s32.totalorder %s2576_s25, %s2572_s1 }
  0x2c   : > { %466 = vmatpush.msrb.mxu1 %v2895_v27  ;;  %595 = vmatpush.msrb.mxu3 %v2907_v29 }
  0x2d   : > { %520 = vmatpush.msrb.mxu0 %v2902_v28  ;;  %682 = vmatpush.msrb.mxu2 %v2772_v7  ;;  %p2574_p12 = pnand %p2573_p11, %p2720_p5  ;;  %p2579_p2 = por %p2578_p1, %p2577_p0 }
  0x2e   : > { %2272 = vmatmul.msk.f32.vlgmr.msrb.gmra.mxu1 %vm404_vm0, %v384_v16  ;;  %2283 = vmatmul.msk.f32.vlgmr.msrb.gmra.mxu0 %vm404_vm0, %v2914_v30 }
  0x2f   : > { %537 = vmatpush.msra.mxu1 %v2919_v31  ;;  %596 = vmatpush.msrb.mxu3 %v2926_v32  ;;  %p2575_p13 = pneg %p2574_p12 }
  0x30   : > { %628 = vmatpush.msra.mxu0 %v2931_v33  ;;  %683 = vmatpush.msrb.mxu2 %v2797_v11 }
  0x31   : > { %2295 = vmatmul.msk.f32.vlgmr.msrb.gmra.mxu3 %vm404_vm0, %v2851_v20  ;;  %2306 = vmatmul.msk.f32.vlgmr.msrb.gmra.mxu2 %vm404_vm0, %v2914_v30  ;;  %p2580_p3 = pnand %p2579_p2, %p2575_p13 }
  0x32   : > { %538 = vmatpush.msra.mxu1 %v2941_v34  ;;  %629 = vmatpush.msra.mxu0 %v2948_v35 }
  0x33   : > { %700 = vmatpush.msra.mxu3 %v2738_v1  ;;  %760 = vmatpush.msra.mxu2 %v2839_v18 }
  0x34   : > { %539 = vmatpush.msra.mxu1 %v2956_v36  ;;  %630 = vmatpush.msra.mxu0 %v2964_v37 }
  0x35   : > { %701 = vmatpush.msra.mxu3 %v2756_v4  ;;  %761 = vmatpush.msra.mxu2 %v2863_v22 }
  0x36   : > { %540 = vmatpush.msra.mxu1 %v2971_v38  ;;  %631 = vmatpush.msra.mxu0 %v2978_v39 }
  0x37   : > { %702 = vmatpush.msra.mxu3 %v2777_v8  ;;  %762 = vmatpush.msra.mxu2 %v2883_v25 }
  0x38   : > { %2284 = vmatmul.msk.f32.vlgmr.msra.gmra.mxu1 %vm404_vm0, %v2914_v30  ;;  %2304 = vmatmul.msk.f32.vlgmr.msra.gmra.mxu0 %vm404_vm0, %v2985_v40 }
  0x39   : > { %648 = vmatpush.msrb.mxu1 %v2990_v41  ;;  %703 = vmatpush.msra.mxu3 %v2802_v12 }
  0x3a   : > { %720 = vmatpush.msrb.mxu0 %v2832_v17  ;;  %763 = vmatpush.msra.mxu2 %v2902_v28 }
  0x3b   : > { %2307 = vmatmul.msk.f32.vlgmr.msra.gmra.mxu3 %vm404_vm0, %v2914_v30  ;;  %2310 = vmatmul.msk.f32.vlgmr.msra.gmra.mxu2 %vm404_vm0, %v2851_v20 }
  0x3c   : > { %649 = vmatpush.msrb.mxu1 %v3003_v42  ;;  %721 = vmatpush.msrb.mxu0 %v2856_v21 }
  0x3d   : > { %780 = vmatpush.msrb.mxu3 %v2919_v31  ;;  %848 = vmatpush.msrb.mxu2 %v2931_v33 }
  0x3e   : > { %650 = vmatpush.msrb.mxu1 %v3013_v43  ;;  %722 = vmatpush.msrb.mxu0 %v2875_v24 }
  0x3f   : > { %781 = vmatpush.msrb.mxu3 %v2941_v34  ;;  %849 = vmatpush.msrb.mxu2 %v2948_v35 }
  0x40   : > { %651 = vmatpush.msrb.mxu1 %v3023_v44  ;;  %723 = vmatpush.msrb.mxu0 %v2895_v27 }
  0x41   : > { %782 = vmatpush.msrb.mxu3 %v2956_v36  ;;  %850 = vmatpush.msrb.mxu2 %v2964_v37 }
  0x42   : > { %2305 = vmatmul.msk.f32.vlgmr.msrb.gmra.mxu1 %vm404_vm0, %v2985_v40  ;;  %2308 = vmatmul.msk.f32.vlgmr.msrb.gmra.mxu0 %vm404_vm0, %v2824_v15 }
  0x43   : > { %740 = vmatpush.msra.mxu1 %v2743_v2  ;;  %783 = vmatpush.msrb.mxu3 %v2971_v38 }
  0x44   : > { %802 = vmatpush.msra.mxu0 %v2767_v6  ;;  %851 = vmatpush.msrb.mxu2 %v2978_v39 }
  0x45   : > { %2311 = vmatmul.msk.f32.vlgmr.msrb.gmra.mxu3 %vm404_vm0, %v2851_v20  ;;  %2315 = vmatmul.msk.f32.vlgmr.msrb.gmra.mxu2 %vm404_vm0, %v3040_v45 }
  0x46   : > { %741 = vmatpush.msra.mxu1 %v2761_v5  ;;  %803 = vmatpush.msra.mxu0 %v2790_v10 }
  0x47   : > { %868 = vmatpush.msra.mxu3 %v2990_v41  ;;  %946 = vmatpush.msra.mxu2 %v2832_v17 }
  0x48   : > { %742 = vmatpush.msra.mxu1 %v2785_v9  ;;  %804 = vmatpush.msra.mxu0 %v2814_v14 }
  0x49   : > { %869 = vmatpush.msra.mxu3 %v3003_v42  ;;  %947 = vmatpush.msra.mxu2 %v2856_v21 }
  0x4a   : > { %743 = vmatpush.msra.mxu1 %v2809_v13  ;;  %805 = vmatpush.msra.mxu0 %v2844_v19 }
  0x4b   : > { %870 = vmatpush.msra.mxu3 %v3013_v43  ;;  %948 = vmatpush.msra.mxu2 %v2875_v24 }
  0x4c   : > { %2309 = vmatmul.msk.f32.vlgmr.msra.gmra.mxu1 %vm404_vm0, %v2824_v15  ;;  %2312 = vmatmul.msk.f32.vlgmr.msra.gmra.mxu0 %vm404_vm0, %v2985_v40 }
  0x4d   : > { %822 = vmatpush.msrb.mxu1 %v2868_v23  ;;  %871 = vmatpush.msra.mxu3 %v3023_v44 }
  0x4e   : > { %906 = vmatpush.msrb.mxu0 %v2733_v0  ;;  %949 = vmatpush.msra.mxu2 %v2895_v27 }
  0x4f   : > { %2316 = vmatmul.msk.f32.vlgmr.msra.gmra.mxu3 %vm404_vm0, %v3040_v45  ;;  %2319 = vmatmul.msk.f32.vlgmr.msra.gmra.mxu2 %vm404_vm0, %v2914_v30 }
  0x50   : > { %823 = vmatpush.msrb.mxu1 %v2888_v26  ;;  %907 = vmatpush.msrb.mxu0 %v2751_v3 }
  0x51   : > { %966 = vmatpush.msrb.mxu3 %v2743_v2  ;;  %1028 = vmatpush.msrb.mxu2 %v2767_v6 }
  0x52   : > { %824 = vmatpush.msrb.mxu1 %v2907_v29  ;;  %908 = vmatpush.msrb.mxu0 %v2772_v7 }
  0x53   : > { %967 = vmatpush.msrb.mxu3 %v2761_v5  ;;  %1029 = vmatpush.msrb.mxu2 %v2790_v10 }
  0x54   : > { %825 = vmatpush.msrb.mxu1 %v2926_v32  ;;  %909 = vmatpush.msrb.mxu0 %v2797_v11 }
  0x55   : > { %968 = vmatpush.msrb.mxu3 %v2785_v9  ;;  %2313 = vmatmul.msk.f32.vlgmr.msrb.gmra.mxu1 %vm404_vm0, %v2985_v40 }
  0x56   : > { %2317 = vmatmul.msk.f32.vlgmr.msrb.gmra.mxu0 %vm404_vm0, %v2851_v20  ;;  %926 = vmatpush.msra.mxu1 %v2738_v1 }
  0x57   : > { %969 = vmatpush.msrb.mxu3 %v2809_v13  ;;  %986 = vmatpush.msra.mxu0 %v2839_v18 }
  0x58   : > { %1030 = vmatpush.msrb.mxu2 %v2814_v14  ;;  %2320 = vmatmul.msk.f32.vlgmr.msrb.gmra.mxu3 %vm404_vm0, %v2914_v30 }
  0x59   : > { %927 = vmatpush.msra.mxu1 %v2756_v4  ;;  %987 = vmatpush.msra.mxu0 %v2863_v22 }
  0x5a   : > { %1031 = vmatpush.msrb.mxu2 %v2844_v19  ;;  %1048 = vmatpush.msra.mxu3 %v2868_v23 }
  0x5b   : > { %2323 = vmatmul.msk.f32.vlgmr.msrb.gmra.mxu2 %vm404_vm0, %v3040_v45  ;;  %928 = vmatpush.msra.mxu1 %v2777_v8 }
  0x5c   : > { %988 = vmatpush.msra.mxu0 %v2883_v25  ;;  %1120 = vmatpush.msra.mxu2 %v2733_v0 }
  0x5d   : > { %929 = vmatpush.msra.mxu1 %v2802_v12  ;;  %1049 = vmatpush.msra.mxu3 %v2888_v26 }
  0x5e   : > { %989 = vmatpush.msra.mxu0 %v2902_v28  ;;  %1121 = vmatpush.msra.mxu2 %v2751_v3 }
  0x5f   : > { %2318 = vmatmul.msk.f32.vlgmr.msra.gmra.mxu1 %vm404_vm0, %v2851_v20  ;;  %2321 = vmatmul.msk.f32.vlgmr.msra.gmra.mxu0 %vm404_vm0, %v2985_v40 }
  0x60   : > { %1006 = vmatpush.msrb.mxu1 %v2919_v31  ;;  %1050 = vmatpush.msra.mxu3 %v2907_v29 }
  0x61   : > { %1074 = vmatpush.msrb.mxu0 %v2931_v33  ;;  %1122 = vmatpush.msra.mxu2 %v2772_v7 }
  0x62   : > { %1007 = vmatpush.msrb.mxu1 %v2941_v34  ;;  %1051 = vmatpush.msra.mxu3 %v2926_v32 }
  0x63   : > { %1075 = vmatpush.msrb.mxu0 %v2948_v35  ;;  %1123 = vmatpush.msra.mxu2 %v2797_v11 }
  0x64   : > { %2324 = vmatmul.msk.f32.vlgmr.msra.gmra.mxu3 %vm404_vm0, %v3040_v45  ;;  %2328 = vmatmul.msk.f32.vlgmr.msra.gmra.mxu2 %vm404_vm0, %v2985_v40 }
  0x65   : > { %1008 = vmatpush.msrb.mxu1 %v2956_v36  ;;  %1076 = vmatpush.msrb.mxu0 %v2964_v37 }
  0x66   : > { %1140 = vmatpush.msrb.mxu3 %v2738_v1  ;;  %1200 = vmatpush.msrb.mxu2 %v2839_v18  ;;  %v658_v1 = vld [vmem:[%s4342_s2] sm:$0x3] }
  0x67   : > { %1009 = vmatpush.msrb.mxu1 %v2971_v38  ;;  %1077 = vmatpush.msrb.mxu0 %v2978_v39 }
  0x68   : > { %1141 = vmatpush.msrb.mxu3 %v2756_v4  ;;  %1201 = vmatpush.msrb.mxu2 %v2863_v22  ;;  %v3190_v4 = vperm.slane %v658_v1, 0 }
  0x69   : > { %2322 = vmatmul.msk.f32.vlgmr.msrb.gmra.mxu1 %vm404_vm0, %v2985_v40  ;;  %2326 = vmatmul.msk.f32.vlgmr.msrb.gmra.mxu0 %vm404_vm0, %v2325_v46 }
  0x6a   : > { %1094 = vmatpush.msra.mxu1 %v2990_v41  ;;  %1142 = vmatpush.msrb.mxu3 %v2777_v8 }
  0x6b   : > { %1160 = vmatpush.msra.mxu0 %v2832_v17  ;;  %1202 = vmatpush.msrb.mxu2 %v2883_v25 }
  0x6c   : > { %1095 = vmatpush.msra.mxu1 %v3003_v42  ;;  %1143 = vmatpush.msrb.mxu3 %v2802_v12 }
  0x6d   : > { %1161 = vmatpush.msra.mxu0 %v2856_v21  ;;  %1203 = vmatpush.msrb.mxu2 %v2902_v28  ;;  %v3194_v21 = vperm.slane %v658_v1, 1 }
  0x6e   : > { %2329 = vmatmul.msk.f32.vlgmr.msrb.gmra.mxu3 %vm404_vm0, %v2985_v40  ;;  %2332 = vmatmul.msk.f32.vlgmr.msrb.gmra.mxu2 %vm404_vm0, %v3040_v45 }
  0x6f   : > { %1096 = vmatpush.msra.mxu1 %v3013_v43  ;;  %1162 = vmatpush.msra.mxu0 %v2875_v24 }
  0x70   : > { %1220 = vmatpush.msra.mxu3 %v2919_v31  ;;  %1288 = vmatpush.msra.mxu2 %v2931_v33 }
  0x71   : > { %1097 = vmatpush.msra.mxu1 %v3023_v44  ;;  %1163 = vmatpush.msra.mxu0 %v2895_v27 }
  0x72   : > { %1221 = vmatpush.msra.mxu3 %v2941_v34  ;;  %1289 = vmatpush.msra.mxu2 %v2948_v35 }
  0x73   : > { %2327 = vmatmul.msk.f32.vlgmr.msra.gmra.mxu1 %vm404_vm0, %v2325_v46  ;;  %2330 = vmatmul.msk.f32.vlgmr.msra.gmra.mxu0 %vm404_vm0, %v2851_v20 }
  0x74   : > { %1180 = vmatpush.msrb.mxu1 %v2743_v2  ;;  %1222 = vmatpush.msra.mxu3 %v2956_v36 }
  0x75   : > { %1242 = vmatpush.msrb.mxu0 %v2767_v6  ;;  %1290 = vmatpush.msra.mxu2 %v2964_v37 }
  0x76   : > { %1181 = vmatpush.msrb.mxu1 %v2761_v5  ;;  %1223 = vmatpush.msra.mxu3 %v2971_v38 }
  0x77   : > { %1243 = vmatpush.msrb.mxu0 %v2790_v10  ;;  %1291 = vmatpush.msra.mxu2 %v2978_v39 }
  0x78   : > { %2333 = vmatmul.msk.f32.vlgmr.msra.gmra.mxu3 %vm404_vm0, %v3040_v45  ;;  %2337 = vmatmul.msk.f32.vlgmr.msra.gmra.mxu2 %vm404_vm0, %v2336_v47  ;;  %v3216_v45 = vld [vmem:[%s4343_s3 + $0x90] sm:$0xff] }
  0x79   : > { %1182 = vmatpush.msrb.mxu1 %v2785_v9  ;;  %1244 = vmatpush.msrb.mxu0 %v2814_v14 }
  0x7a   : > { %1308 = vmatpush.msrb.mxu3 %v2990_v41 }
  0x7b   : > { %1183 = vmatpush.msrb.mxu1 %v2809_v13  ;;  %1245 = vmatpush.msrb.mxu0 %v2844_v19 }
  0x7c   : > { %1309 = vmatpush.msrb.mxu3 %v3003_v42  ;;  %2331 = vmatmul.msk.f32.vlgmr.msrb.gmra.mxu1 %vm404_vm0, %v2851_v20 }
  0x7d   : > { %2334 = vmatmul.msk.f32.vlgmr.msrb.gmra.mxu0 %vm404_vm0, %v2325_v46  ;;  %1262 = vmatpush.msra.mxu1 %v2868_v23 }
  0x7e   : > { %1310 = vmatpush.msrb.mxu3 %v3013_v43  ;;  %v3206_v43 = vld [vmem:[%s4343_s3 + $0xa0] sm:$0xf] }
  0x7f   : > { %1263 = vmatpush.msra.mxu1 %v2888_v26  ;;  %2365 = vmatpush.msk.msrb.mxu2 %vm1382_vm1, %v3206_v43 }
  0x80   : > { %1311 = vmatpush.msrb.mxu3 %v3023_v44  ;;  %v3211_v44 = vld [vmem:[%s4343_s3 + $0xa8] sm:$0xf] }
  0x81   : > { %2338 = vmatmul.msk.f32.vlgmr.msrb.gmra.mxu3 %vm404_vm0, %v2336_v47  ;;  %1264 = vmatpush.msra.mxu1 %v2907_v29  ;;  %v3230_v47 = vld [vmem:[%s4343_s3 + $0x80] sm:$0xff] }
  0x82   : > { %2367 = vmatpush.msk.msra.mxu3 %vm1382_vm1, %v3211_v44  ;;  %1444 = vmatpush.msrb.mxu2 %v3216_v45 }
  0x83   : > { %1265 = vmatpush.msra.mxu1 %v2926_v32 }
  0x84   : > { %2335 = vmatmul.msk.f32.vlgmr.msra.gmra.mxu1 %vm404_vm0, %v2325_v46  ;;  %v3225_v46 = vld [vmem:[%s4343_s3 + $0x98] sm:$0xff]  ;;  %1445 = vmatpush.msrb.mxu2 %v3230_v47 }
  0x85   : > { %1464 = vmatpush.msra.mxu3 %v3225_v46 }
  0xa1   : > { %v425_v48 = vpop.f32.mrf.mxu0 }
  0xa2   : > { %v445_v49 = vpop.f32.mrf.mxu1 }
  0xa8   : > { %v488_v53 = vpop.f32.mrf.mxu3 }
  0xa9   : > { %v489_v7 = vadd.f32 %v488_v53, %v445_v49  ;;  %v3242_v53 = vld [vmem:[%s4343_s3 + $0x70] sm:$0xff] }
  0xaa   : > { %1446 = vmatpush.msrb.mxu2 %v3242_v53 }
  0xab   : > { %v468_v50 = vpop.f32.mrf.mxu1  ;;  %v522_v51 = vpop.f32.mrf.mxu0 }
  0xac   : > { %v578_v52 = vpop.f32.mrf.mxu2  ;;  %v469_v58 = vadd.f32 %v468_v50, %v425_v48  ;;  %v3235_v48 = vld [vmem:[%s4343_s3 + $0x88] sm:$0xff] }
  0xad   : > { %1465 = vmatpush.msra.mxu3 %v3235_v48 }
  0xae   : > { %v545_v63 = vadd.f32 %v522_v51, %v469_v58  ;;  %v3259_v58 = vld [vmem:[%s4343_s3 + $0x68] sm:$0xff] }
  0xb0   : > { %v601_v2 = vadd.f32 %v578_v52, %v545_v63 }
  0xb4   : > { %v598_v56 = vpop.f32.mrf.mxu3  ;;  %v685_v57 = vpop.f32.mrf.mxu2 }
  0xb5   : > { %v542_v54 = vpop.f32.mrf.mxu1  ;;  %v633_v55 = vpop.f32.mrf.mxu0 }
  0xb6   : > { %v656_v3 = vadd.f32 %v633_v55, %v601_v2  ;;  %v546_v11 = vadd.f32 %v542_v54, %v489_v7  ;;  %v3247_v54 = vld [vmem:[%s4343_s3 + $0x78] sm:$0xff] }
  0xb7   : > { %1466 = vmatpush.msra.mxu3 %v3247_v54 }
  0xb8   : > { %v664_v13 = vadd.f32 %v3190_v4, %v656_v3  ;;  %v602_v17 = vadd.f32 %v598_v56, %v546_v11 }
  0xb9   : > { %1467 = vmatpush.msra.mxu3 %v3259_v58 }
  0xba   : > { %v666_v18 = vmax.f32 %v664_v13, 0.0 }
  0xbe   : > { %v705_v61 = vpop.f32.mrf.mxu3  ;;  %v765_v62 = vpop.f32.mrf.mxu2 }
  0xbf   : > { %v653_v59 = vpop.f32.mrf.mxu1  ;;  %v725_v60 = vpop.f32.mrf.mxu0 }
  0xc0   : > { %v726_v0 = vadd.f32 %v725_v60, %v685_v57  ;;  %v657_v20 = vadd.f32 %v653_v59, %v602_v17  ;;  %v3254_v57 = vld [vmem:[%s4343_s3 + $0x60] sm:$0xff] }
  0xc1   : > { %1447 = vmatpush.msrb.mxu2 %v3254_v57 }
  0xc2   : > { %v788_v5 = vadd.f32 %v765_v62, %v726_v0  ;;  %v665_v28 = vadd.f32 %v3194_v21, %v657_v20 }
  0xc4   : > { %v667_v32 = vmax.f32 %v665_v28, 0.0  ;;  %v3282_v28 = vld [vmem:[%s4343_s3 + $0x58] sm:$0xff] }
  0xc5   : > { %1468 = vmatpush.msra.mxu3 %v3282_v28 }
  0xc8   : > { %v785_v9 = vpop.f32.mrf.mxu3  ;;  %v853_v12 = vpop.f32.mrf.mxu2 }
  0xc9   : > { %v745_v6 = vpop.f32.mrf.mxu1  ;;  %v807_v8 = vpop.f32.mrf.mxu0 }
  0xca   : > { %v830_v10 = vadd.f32 %v807_v8, %v788_v5  ;;  %v746_v15 = vadd.f32 %v745_v6, %v705_v61 }
  0xcc   : > { %v876_v14 = vadd.f32 %v853_v12, %v830_v10  ;;  %v789_v22 = vadd.f32 %v785_v9, %v746_v15 }
  0xce   : > { %v878_v16 = vadd.f32 %v876_v14, %v3190_v4 }
  0xd0   : > { %v880_v19 = vmax.f32 %v878_v16, 0.0 }
  0xd2   : > { %v827_v23 = vpop.f32.mrf.mxu1  ;;  %v3196_v25 = vmax.f32 %v666_v18, %v880_v19  ;;  %v873_v27 = vpop.f32.mrf.mxu3 }
  0xd3   : > { %v911_v24 = vpop.f32.mrf.mxu0  ;;  %v831_v26 = vadd.f32 %v827_v23, %v789_v22  ;;  %v951_v30 = vpop.f32.mrf.mxu2 }
  0xd4   : > { %886 = vrot.lane.b32.xlu0 %v3196_v25, %s2620_s12  ;;  %v952_v50 = vadd.f32 %v951_v30, %v911_v24  ;;  %v3299_v30 = vld [vmem:[%s4343_s3 + $0x30] sm:$0xff] }
  0xd5   : > { %v877_v29 = vadd.f32 %v873_v27, %v831_v26  ;;  %v3277_v27 = vld [vmem:[%s4343_s3 + $0x50] sm:$0xff] }
  0xd6   : > { %1448 = vmatpush.msrb.mxu2 %v3277_v27 }
  0xd7   : > { %v879_v31 = vadd.f32 %v877_v29, %v3194_v21  ;;  %v3287_v29 = vld [vmem:[%s4343_s3 + $0x40] sm:$0xff] }
  0xd8   : > { %1449 = vmatpush.msrb.mxu2 %v3287_v29 }
  0xd9   : > { %v881_v33 = vmax.f32 %v879_v31, 0.0  ;;  %v3304_v31 = vld [vmem:[%s4343_s3 + $0x38] sm:$0xff] }
  0xda   : > { %1450 = vmatpush.msrb.mxu2 %v3299_v30 }
  0xdb   : > { %v883_v35 = vmax.f32 %v667_v32, %v881_v33  ;;  %v971_v38 = vpop.f32.mrf.mxu3  ;;  %v3311_v32 = vld [vmem:[%s4343_s3 + $0x20] sm:$0xff]  ;;  %v3316_v33 = vld [vmem:[%s4343_s3 + $0x28] sm:$0xff] }
  0xdc   : > { %v931_v34 = vpop.f32.mrf.mxu1  ;;  %v991_v36 = vpop.f32.mrf.mxu0  ;;  %1451 = vmatpush.msrb.mxu2 %v3311_v32 }
  0xdd   : > { %888 = vrot.lane.b32.xlu0 %v883_v35, %s2620_s12  ;;  %v1014_v56 = vadd.f32 %v991_v36, %v952_v50  ;;  %v972_v61 = vadd.f32 %v971_v38, %v931_v34  ;;  %v3325_v34 = vld [vmem:[%s4343_s3 + $0x10] sm:$0xff]  ;;  %v3330_v35 = vld [vmem:[%s4343_s3 + $0x18] sm:$0xff]  ;;  %v3347_v38 = vld [vmem:[%s4343_s3] sm:$0xff] }
  0xde   : > { %v1033_v37 = vpop.f32.mrf.mxu2  ;;  %v3335_v36 = vld [vmem:[%s4343_s3 + $0x150] sm:$0xf]  ;;  %1452 = vmatpush.msrb.mxu2 %v3325_v34 }
  0xdf   : > { %v1056_v60 = vadd.f32 %v1033_v37, %v1014_v56  ;;  %v3342_v37 = vld [vmem:[%s4343_s3 + $0x158] sm:$0xf]  ;;  %2361 = vmatpush.msk.msra.mxu0 %vm1382_vm1, %v3335_v36  ;;  %v3383_v50 = vld [vmem:[%s4343_s3 + $0x130] sm:$0xff]  ;;  %v3409_v56 = vld [vmem:[%s4343_s3 + $0x120] sm:$0xff] }
  0xe0   : > { %2363 = vmatpush.msk.msrb.mxu1 %vm1382_vm1, %v3342_v37  ;;  %1453 = vmatpush.msrb.mxu2 %v3347_v38 }
  0xe6   : > { %v1011_v39 = vpop.f32.mrf.mxu1  ;;  %v1079_v40 = vpop.f32.mrf.mxu0 }
  0xe7   : > { %v1053_v41 = vpop.f32.mrf.mxu3  ;;  %v1125_v42 = vpop.f32.mrf.mxu2  ;;  %v1102_v62 = vadd.f32 %v1079_v40, %v1056_v60  ;;  %v1015_v2 = vadd.f32 %v1011_v39, %v972_v61  ;;  %v3352_v39 = vld [vmem:[%s4343_s3 + $0x8] sm:$0xff]  ;;  %v3361_v40 = vld [vmem:[%s4343_s3 + $0x140] sm:$0xff]  ;;  %v3421_v60 = vld [vmem:[%s4343_s3 + $0x290] sm:$0xff] }
  0xe8   : > { %1395 = vmatpush.msra.mxu0 %v3361_v40  ;;  %4376 = vst [vmem:[#allocation5_spill] sm:$0xff] %v3421_v60  ;;  %v3426_v61 = vld [vmem:[%s4343_s3 + $0x298] sm:$0xff] }
  0xe9   : > { %v1104_v7 = vadd.f32 %v1102_v62, %v3190_v4  ;;  %v1057_v10 = vadd.f32 %v1053_v41, %v1015_v2  ;;  %v3366_v41 = vld [vmem:[%s4343_s3 + $0x148] sm:$0xff]  ;;  %4377 = vst [vmem:[#allocation6_spill] sm:$0xff] %v3426_v61  ;;  %v3433_v62 = vld [vmem:[%s4343_s3 + $0x110] sm:$0xff]  ;;  %v3457_v2 = vld [vmem:[%s4343_s3 + $0x100] sm:$0xff] }
  0xea   : > { %1415 = vmatpush.msrb.mxu1 %v3366_v41  ;;  %1396 = vmatpush.msra.mxu0 %v3383_v50 }
  0xeb   : > { %v1106_v12 = vmax.f32 %v1104_v7, 0.0  ;;  %v3481_v7 = vld [vmem:[%s4343_s3 + $0xf0] sm:$0xff] }
  0xec   : > { %1397 = vmatpush.msra.mxu0 %v3409_v56 }
  0xee   : > { %1398 = vmatpush.msra.mxu0 %v3433_v62 }
  0xf0   : > { %v1099_v49 = vpop.f32.mrf.mxu1  ;;  %v1165_v51 = vpop.f32.mrf.mxu0  ;;  %1399 = vmatpush.msra.mxu0 %v3457_v2 }
  0xf1   : > { %v1145_v52 = vpop.f32.mrf.mxu3  ;;  %v1205_v55 = vpop.f32.mrf.mxu2  ;;  %v1166_v59 = vadd.f32 %v1165_v51, %v1125_v42  ;;  %v1103_v13 = vadd.f32 %v1099_v49, %v1057_v10  ;;  %v3371_v42 = vld [vmem:[%s4343_s3 + $0x2b0] sm:$0xf]  ;;  %v3378_v49 = vld [vmem:[%s4343_s3 + $0x2b8] sm:$0xf]  ;;  %v3498_v10 = vld [vmem:[%s4343_s3 + $0x268] sm:$0xff] }
  0xf2   : > { %v3388_v51 = vld [vmem:[%s4343_s3 + $0x138] sm:$0xff]  ;;  %2417 = vmatpush.msk.msra.mxu2 %vm1382_vm1, %v3371_v42  ;;  %4383 = vst [vmem:[#allocation12_spill] sm:$0xff] %v3498_v10  ;;  %1400 = vmatpush.msra.mxu0 %v3481_v7 }
  0xf3   : > { %v1228_v63 = vadd.f32 %v1205_v55, %v1166_v59  ;;  %v1105_v20 = vadd.f32 %v1103_v13, %v3194_v21  ;;  %v3400_v55 = vld [vmem:[%s4343_s3 + $0x2a8] sm:$0xff]  ;;  %1416 = vmatpush.msrb.mxu1 %v3388_v51  ;;  %v3517_v13 = vld [vmem:[%s4343_s3 + $0x250] sm:$0xff] }
  0xf4   : > { %v3414_v59 = vld [vmem:[%s4343_s3 + $0x128] sm:$0xff]  ;;  %4384 = vst [vmem:[#allocation13_spill] sm:$0xff] %v3517_v13 }
  0xf5   : > { %v1107_v24 = vmax.f32 %v1105_v20, 0.0  ;;  %1417 = vmatpush.msrb.mxu1 %v3414_v59  ;;  %v3553_v20 = vld [vmem:[%s4343_s3 + $0xc0] sm:$0xff] }
  0xf9   : > { %v1185_v0 = vpop.f32.mrf.mxu1 }
  0xfa   : > { %v1247_v1 = vpop.f32.mrf.mxu0  ;;  %v1186_v8 = vadd.f32 %v1185_v0, %v1145_v52  ;;  %v3395_v52 = vld [vmem:[%s4343_s3 + $0x2a0] sm:$0xff] }
  0xfb   : > { %v1270_v3 = vadd.f32 %v1247_v1, %v1228_v63  ;;  %v1225_v5 = vpop.f32.mrf.mxu3  ;;  %v1293_v6 = vpop.f32.mrf.mxu2  ;;  %1590 = vmatpush.msra.mxu2 %v3395_v52  ;;  %v3438_v63 = vld [vmem:[%s4343_s3 + $0x118] sm:$0xff]  ;;  %v3445_v0 = vld [vmem:[%s4343_s3 + $0x280] sm:$0xff]  ;;  %v3450_v1 = vld [vmem:[%s4343_s3 + $0x288] sm:$0xff] }
  0xfc   : > { %v1229_v14 = vadd.f32 %v1225_v5, %v1186_v8  ;;  %4378 = vst [vmem:[#allocation7_spill] sm:$0xff] %v3445_v0  ;;  %1418 = vmatpush.msrb.mxu1 %v3438_v63  ;;  %v3469_v5 = vld [vmem:[%s4343_s3 + $0x270] sm:$0xff]  ;;  %v3486_v8 = vld [vmem:[%s4343_s3 + $0xf8] sm:$0xff] }
  0xfd   : > { %v1316_v9 = vadd.f32 %v1293_v6, %v1270_v3  ;;  %4379 = vst [vmem:[#allocation8_spill] sm:$0xff] %v3450_v1  ;;  %1591 = vmatpush.msra.mxu2 %v3421_v60  ;;  %v3462_v3 = vld [vmem:[%s4343_s3 + $0x108] sm:$0xff]  ;;  %v3474_v6 = vld [vmem:[%s4343_s3 + $0x278] sm:$0xff] }
  0xfe   : > { %4380 = vst [vmem:[#allocation9_spill] sm:$0xff] %v3469_v5  ;;  %1419 = vmatpush.msrb.mxu1 %v3462_v3  ;;  %v3676_v60 = vld [vmem:[%s4343_s3 + $0x1c8] sm:$0xff] }
  0xff   : > { %v1318_v11 = vadd.f32 %v1316_v9, %v3190_v4  ;;  %4381 = vst [vmem:[#allocation10_spill] sm:$0xff] %v3474_v6  ;;  %1592 = vmatpush.msra.mxu2 %v3445_v0  ;;  %v3493_v9 = vld [vmem:[%s4343_s3 + $0x260] sm:$0xff] }
 0x100   : > { %4382 = vst [vmem:[#allocation11_spill] sm:$0xff] %v3493_v9  ;;  %1420 = vmatpush.msrb.mxu1 %v3486_v8 }
 0x101   : > { %v1320_v15 = vmax.f32 %v1318_v11, 0.0  ;;  %v1267_v16 = vpop.f32.mrf.mxu1  ;;  %1593 = vmatpush.msra.mxu2 %v3469_v5  ;;  %v3505_v11 = vld [vmem:[%s4343_s3 + $0xe0] sm:$0xff] }
 0x102   : > { %v1271_v17 = vadd.f32 %v1267_v16, %v1229_v14  ;;  %v3522_v14 = vld [vmem:[%s4343_s3 + $0x258] sm:$0xff]  ;;  %1401 = vmatpush.msra.mxu0 %v3505_v11 }
 0x103   : > { %v3267_v18 = vmax.f32 %v1106_v12, %v1320_v15  ;;  %v3510_v12 = vld [vmem:[%s4343_s3 + $0xe8] sm:$0xff]  ;;  %4385 = vst [vmem:[#allocation14_spill] sm:$0xff] %v3522_v14  ;;  %1594 = vmatpush.msra.mxu2 %v3493_v9  ;;  %v3529_v15 = vld [vmem:[%s4343_s3 + $0xd0] sm:$0xff]  ;;  %v3534_v16 = vld [vmem:[%s4343_s3 + $0xd8] sm:$0xff] }
 0x104   : > { %v1313_v19 = vpop.f32.mrf.mxu3  ;;  %1421 = vmatpush.msrb.mxu1 %v3510_v12  ;;  %1402 = vmatpush.msra.mxu0 %v3529_v15  ;;  %v3625_v9 = vld [vmem:[%s4343_s3 + $0x1f0] sm:$0xff] }
 0x105   : > { %v1317_v22 = vadd.f32 %v1313_v19, %v1271_v17  ;;  %1326 = vrot.lane.b32.xlu1 %v3267_v18, %s2620_s12  ;;  %v3541_v17 = vld [vmem:[%s4343_s3 + $0x240] sm:$0xff]  ;;  %v3546_v19 = vld [vmem:[%s4343_s3 + $0x248] sm:$0xff]  ;;  %1595 = vmatpush.msra.mxu2 %v3517_v13 }
 0x106   : > { %4386 = vst [vmem:[#allocation15_spill] sm:$0xff] %v3541_v17  ;;  %1422 = vmatpush.msrb.mxu1 %v3534_v16  ;;  %1403 = vmatpush.msra.mxu0 %v3553_v20  ;;  %v3601_v13 = vld [vmem:[%s4343_s3 + $0x200] sm:$0xf] }
 0x107   : > { %v1319_v23 = vadd.f32 %v1317_v22, %v3194_v21  ;;  %v3294_v21 = vld [vmem:[%s4343_s3 + $0x48] sm:$0xff]  ;;  %4387 = vst [vmem:[#allocation16_spill] sm:$0xff] %v3546_v19  ;;  %1596 = vmatpush.msra.mxu2 %v3541_v17  ;;  %v3589_v17 = vld [vmem:[%s4343_s3 + $0x220] sm:$0xff] }
 0x108   : > { %1469 = vmatpush.msra.mxu3 %v3294_v21  ;;  %v3558_v22 = vld [vmem:[%s4343_s3 + $0xc8] sm:$0xff]  ;;  %4390 = vst [vmem:[#allocation19_spill] sm:$0xff] %v3589_v17 }
 0x109   : > { %v1321_v26 = vmax.f32 %v1319_v23, 0.0  ;;  %v3565_v23 = vld [vmem:[%s4343_s3 + $0x230] sm:$0xff]  ;;  %1423 = vmatpush.msrb.mxu1 %v3558_v22 }
 0x10a   : > { %1470 = vmatpush.msra.mxu3 %v3304_v31  ;;  %4388 = vst [vmem:[#allocation17_spill] sm:$0xff] %v3565_v23  ;;  %1597 = vmatpush.msra.mxu2 %v3565_v23  ;;  %v3613_v23 = vld [vmem:[%s4343_s3 + $0x210] sm:$0xff] }
 0x10b   : > { %v1323_v4 = vmax.f32 %v1107_v24, %v1321_v26  ;;  %v3570_v24 = vld [vmem:[%s4343_s3 + $0x238] sm:$0xff]  ;;  %4392 = vst [vmem:[#allocation21_spill] sm:$0xff] %v3613_v23 }
 0x10c   : > { %1471 = vmatpush.msra.mxu3 %v3316_v33  ;;  %4389 = vst [vmem:[#allocation18_spill] sm:$0xff] %v3570_v24  ;;  %1598 = vmatpush.msra.mxu2 %v3589_v17  ;;  %v3646_v17 = vld [vmem:[%s4343_s3 + $0x1e8] sm:$0xff] }
 0x10d   : > { %1328 = vrot.lane.b32.xlu1 %v1323_v4, %s2620_s12  ;;  %v3577_v4 = vld [vmem:[%s4343_s3 + $0xb0] sm:$0xff]  ;;  %s2621_s12 = smov 48  }
 0x10e   : > { %1472 = vmatpush.msra.mxu3 %v3330_v35  ;;  %1404 = vmatpush.msra.mxu0 %v3577_v4 }
 0x10f   : > { %1599 = vmatpush.msra.mxu2 %v3613_v23  ;;  %v3653_v23 = vld [vmem:[%s4343_s3 + $0x1d0] sm:$0xff] }
 0x110   : > { %1473 = vmatpush.msra.mxu3 %v3352_v39  ;;  %2391 = vmatpush.msk.msrb.mxu0 %vm1382_vm1, %v3601_v13 }
 0x112   : > { %2419 = vmatpush.msk.msrb.mxu3 %vm1382_vm1, %v3378_v49  ;;  %1516 = vmatpush.msrb.mxu0 %v3625_v9 }
 0x114   : > { %1610 = vmatpush.msrb.mxu3 %v3400_v55 }
 0x116   : > { %1611 = vmatpush.msrb.mxu3 %v3426_v61  ;;  %v3671_v61 = vld [vmem:[%s4343_s3 + $0x1c0] sm:$0xff] }
 0x118   : > { %1612 = vmatpush.msrb.mxu3 %v3450_v1 }
 0x11a   : > { %1613 = vmatpush.msrb.mxu3 %v3474_v6  ;;  %v3630_v6 = vld [vmem:[%s4343_s3 + $0x1f8] sm:$0xff] }
 0x11c   : > { %1614 = vmatpush.msrb.mxu3 %v3498_v10  ;;  %v3606_v10 = vld [vmem:[%s4343_s3 + $0x208] sm:$0xf] }
 0x11e   : > { %1615 = vmatpush.msrb.mxu3 %v3522_v14  ;;  %v3582_v14 = vld [vmem:[%s4343_s3 + $0xb8] sm:$0xff] }
 0x11f   : > { %1424 = vmatpush.msrb.mxu1 %v3582_v14 }
 0x120   : > { %1616 = vmatpush.msrb.mxu3 %v3546_v19  ;;  %v3594_v19 = vld [vmem:[%s4343_s3 + $0x228] sm:$0xff] }
 0x121   : > { %4391 = vst [vmem:[#allocation20_spill] sm:$0xff] %v3594_v19  ;;  %2393 = vmatpush.msk.msra.mxu1 %vm1382_vm1, %v3606_v10 }
 0x122   : > { %1617 = vmatpush.msrb.mxu3 %v3570_v24  ;;  %v3618_v24 = vld [vmem:[%s4343_s3 + $0x218] sm:$0xff] }
 0x123   : > { %4393 = vst [vmem:[#allocation22_spill] sm:$0xff] %v3618_v24  ;;  %1536 = vmatpush.msra.mxu1 %v3630_v6 }
 0x124   : > { %1618 = vmatpush.msrb.mxu3 %v3594_v19  ;;  %v3641_v19 = vld [vmem:[%s4343_s3 + $0x1e0] sm:$0xff] }
 0x125   : > { %1517 = vmatpush.msrb.mxu0 %v3641_v19  ;;  %1537 = vmatpush.msra.mxu1 %v3646_v17 }
 0x126   : > { %1619 = vmatpush.msrb.mxu3 %v3618_v24  ;;  %v3658_v24 = vld [vmem:[%s4343_s3 + $0x1d8] sm:$0xff] }
 0x127   : > { %1518 = vmatpush.msrb.mxu0 %v3653_v23  ;;  %1538 = vmatpush.msra.mxu1 %v3658_v24 }
 0x129   : > { %1519 = vmatpush.msrb.mxu0 %v3671_v61  ;;  %1539 = vmatpush.msra.mxu1 %v3676_v60 }
 0x146   : > { %v887_v26 = vpop.permute.xlu0 %886 }
 0x14f   : > { %v889_v5 = vpop.permute.xlu0 %888 }
 0x150   : > { %v891_v1 = vsel %vm890_vm2, %v887_v26, %v889_v5  ;;  %v3860_v26 = vld [vmem:[%s4343_s3 + $0x328] sm:$0xff] }
 0x151   : > { %v3664_v0 = vmax.f32 %v3196_v25, %v891_v1  ;;  %v3693_v25 = vld [vmem:[%s4343_s3 + $0x1b0] sm:$0xff]  ;;  %v3722_v1 = vld [vmem:[%s4343_s3 + $0x198] sm:$0xff] }
 0x152   : > { %1520 = vmatpush.msrb.mxu0 %v3693_v25 }
 0x153   : > { %2366 = vmatmul.msk.f32.vlgmr.msrb.gmra.mxu2 %vm1378_vm3, %v3664_v0  ;;  %2368 = vmatmul.msk.f32.vlgmr.msra.gmra.mxu3 %vm1378_vm3, %v3664_v0 }
 0x154   : > { %2447 = vmatpush.msk.msrb.mxu2 %vm1382_vm1, %v3335_v36  ;;  %2449 = vmatpush.msk.msra.mxu3 %vm1382_vm1, %v3342_v37  ;;  %v3698_v36 = vld [vmem:[%s4343_s3 + $0x1b8] sm:$0xff]  ;;  %v3703_v37 = vld [vmem:[%s4343_s3 + $0x1a0] sm:$0xff] }
 0x155   : > { %1540 = vmatpush.msra.mxu1 %v3698_v36  ;;  %1521 = vmatpush.msrb.mxu0 %v3703_v37 }
 0x156   : > { %1716 = vmatpush.msrb.mxu2 %v3361_v40  ;;  %1736 = vmatpush.msra.mxu3 %v3366_v41  ;;  %v3710_v40 = vld [vmem:[%s4343_s3 + $0x1a8] sm:$0xff]  ;;  %v3717_v41 = vld [vmem:[%s4343_s3 + $0x190] sm:$0xff] }
 0x157   : > { %1541 = vmatpush.msra.mxu1 %v3710_v40  ;;  %1522 = vmatpush.msrb.mxu0 %v3717_v41 }
 0x158   : > { %1717 = vmatpush.msrb.mxu2 %v3383_v50  ;;  %1737 = vmatpush.msra.mxu3 %v3388_v51  ;;  %v3731_v50 = vld [vmem:[%s4343_s3 + $0x180] sm:$0xff]  ;;  %v3736_v51 = vld [vmem:[%s4343_s3 + $0x188] sm:$0xff] }
 0x159   : > { %1542 = vmatpush.msra.mxu1 %v3722_v1  ;;  %1523 = vmatpush.msrb.mxu0 %v3731_v50 }
 0x15a   : > { %1718 = vmatpush.msrb.mxu2 %v3409_v56  ;;  %1738 = vmatpush.msra.mxu3 %v3414_v59  ;;  %v3749_v56 = vld [vmem:[%s4343_s3 + $0x170] sm:$0xff]  ;;  %v3754_v59 = vld [vmem:[%s4343_s3 + $0x178] sm:$0xff] }
 0x15b   : > { %1543 = vmatpush.msra.mxu1 %v3736_v51  ;;  %1524 = vmatpush.msrb.mxu0 %v3749_v56 }
 0x15c   : > { %1719 = vmatpush.msrb.mxu2 %v3433_v62  ;;  %1739 = vmatpush.msra.mxu3 %v3438_v63  ;;  %v3763_v62 = vld [vmem:[%s4343_s3 + $0x160] sm:$0xff]  ;;  %v3768_v63 = vld [vmem:[%s4343_s3 + $0x168] sm:$0xff] }
 0x15d   : > { %1544 = vmatpush.msra.mxu1 %v3754_v59  ;;  %1525 = vmatpush.msrb.mxu0 %v3763_v62 }
 0x15e   : > { %1720 = vmatpush.msrb.mxu2 %v3457_v2  ;;  %1740 = vmatpush.msra.mxu3 %v3462_v3 }
 0x15f   : > { %1545 = vmatpush.msra.mxu1 %v3768_v63 }
 0x160   : > { %1721 = vmatpush.msrb.mxu2 %v3481_v7  ;;  %1741 = vmatpush.msra.mxu3 %v3486_v8  ;;  %v3787_v8 = vld [vmem:[%s4343_s3 + $0x360] sm:$0xf] }
 0x162   : > { %1722 = vmatpush.msrb.mxu2 %v3505_v11  ;;  %1742 = vmatpush.msra.mxu3 %v3510_v12  ;;  %v3792_v11 = vld [vmem:[%s4343_s3 + $0x368] sm:$0xf] }
 0x164   : > { %1723 = vmatpush.msrb.mxu2 %v3529_v15  ;;  %1743 = vmatpush.msra.mxu3 %v3534_v16  ;;  %v3822_v15 = vld [vmem:[%s4343_s3 + $0x340] sm:$0xff]  ;;  %v3827_v16 = vld [vmem:[%s4343_s3 + $0x348] sm:$0xff] }
 0x166   : > { %1724 = vmatpush.msrb.mxu2 %v3553_v20  ;;  %1744 = vmatpush.msra.mxu3 %v3558_v22  ;;  %v3838_v20 = vld [vmem:[%s4343_s3 + $0x330] sm:$0xff]  ;;  %v3843_v22 = vld [vmem:[%s4343_s3 + $0x338] sm:$0xff] }
 0x168   : > { %1725 = vmatpush.msrb.mxu2 %v3577_v4  ;;  %1745 = vmatpush.msra.mxu3 %v3582_v14  ;;  %v3809_v14 = vld [vmem:[%s4343_s3 + $0x358] sm:$0xff]  ;;  %v2423_v4 = vld [vmem:[%s4343_s3 + $0x2d0] sm:$0xff] }
 0x177   : > { %v1327_v2 = vpop.permute.xlu1 %1326 }
 0x17f   : > { %v1329_v3 = vpop.permute.xlu1 %1328 }
 0x180   : > { %v1330_v5 = vsel %vm890_vm2, %v1327_v2, %v1329_v3  ;;  %v1942_v2 = vld [vmem:[%s4345_s5 + $0x38] sm:$0xff]  ;;  %v2474_v3 = vld [vmem:[%s4345_s5 + $0x88] sm:$0xff] }
 0x181   : > { %v3782_v7 = vmax.f32 %v3267_v18, %v1330_v5  ;;  %v3804_v18 = vld [vmem:[%s4343_s3 + $0x350] sm:$0xff] }
 0x183   : > { %2362 = vmatmul.msk.f32.vlgmr.msra.gmra.mxu0 %vm1378_vm3, %v3782_v7  ;;  %2364 = vmatmul.msk.f32.vlgmr.msrb.gmra.mxu1 %vm1378_vm3, %v3782_v7  ;;  %v3799_v12 = vrot.slane %v3782_v7, 1 }
 0x184   : > { %2443 = vmatpush.msk.msra.mxu0 %vm1382_vm1, %v3787_v8  ;;  %2445 = vmatpush.msk.msrb.mxu1 %vm1382_vm1, %v3792_v11 }
 0x185   : > { %2418 = vmatmul.msk.f32.vlgmr.msra.gmra.mxu2 %vm1378_vm3, %v3799_v12  ;;  %2420 = vmatmul.msk.f32.vlgmr.msrb.gmra.mxu3 %vm1378_vm3, %v3799_v12 }
 0x186   : > { %1664 = vmatpush.msra.mxu0 %v3804_v18  ;;  %1684 = vmatpush.msrb.mxu1 %v3809_v14 }
 0x187   : > { %2455 = vmatpush.msk.msra.mxu2 %vm1382_vm1, %v3601_v13  ;;  %2457 = vmatpush.msk.msrb.mxu3 %vm1382_vm1, %v3606_v10  ;;  %v1501_v10 = vrot.slane %v3664_v0, 1  ;;  %v3855_v13 = vld [vmem:[%s4343_s3 + $0x320] sm:$0xff] }
 0x188   : > { %1665 = vmatpush.msra.mxu0 %v3822_v15  ;;  %1685 = vmatpush.msrb.mxu1 %v3827_v16 }
 0x189   : > { %1796 = vmatpush.msra.mxu2 %v3625_v9  ;;  %1816 = vmatpush.msrb.mxu3 %v3630_v6  ;;  %v3869_v6 = vld [vmem:[%s4343_s3 + $0x310] sm:$0xff]  ;;  %v3874_v9 = vld [vmem:[%s4343_s3 + $0x318] sm:$0xff] }
 0x18a   : > { %1666 = vmatpush.msra.mxu0 %v3838_v20  ;;  %1686 = vmatpush.msrb.mxu1 %v3843_v22 }
 0x18b   : > { %1797 = vmatpush.msra.mxu2 %v3641_v19  ;;  %1817 = vmatpush.msrb.mxu3 %v3646_v17  ;;  %v3885_v17 = vld [vmem:[%s4343_s3 + $0x300] sm:$0xff]  ;;  %v3890_v19 = vld [vmem:[%s4343_s3 + $0x308] sm:$0xff] }
 0x18c   : > { %2392 = vmatmul.msk.f32.vlgmr.msrb.gmra.mxu0 %vm1378_vm3, %v1501_v10  ;;  %2394 = vmatmul.msk.f32.vlgmr.msra.gmra.mxu1 %vm1378_vm3, %v1501_v10 }
 0x18d   : > { %1667 = vmatpush.msra.mxu0 %v3855_v13  ;;  %1687 = vmatpush.msrb.mxu1 %v3860_v26 }
 0x18e   : > { %1798 = vmatpush.msra.mxu2 %v3653_v23  ;;  %1818 = vmatpush.msrb.mxu3 %v3658_v24  ;;  %v3899_v23 = vld [vmem:[%s4343_s3 + $0x2f0] sm:$0xff]  ;;  %v3904_v24 = vld [vmem:[%s4343_s3 + $0x2f8] sm:$0xff] }
 0x18f   : > { %1668 = vmatpush.msra.mxu0 %v3869_v6  ;;  %1688 = vmatpush.msrb.mxu1 %v3874_v9 }
 0x190   : > { %2448 = vmatmul.msk.f32.vlgmr.msrb.gmra.mxu2 %vm1378_vm3, %v1501_v10  ;;  %2450 = vmatmul.msk.f32.vlgmr.msra.gmra.mxu3 %vm1378_vm3, %v1501_v10  ;;  %v2486_v10 = vld [vmem:[%s4345_s5 + $0xd8] sm:$0xff] }
 0x191   : > { %1799 = vmatpush.msra.mxu2 %v3671_v61  ;;  %1819 = vmatpush.msrb.mxu3 %v3676_v60  ;;  %v3913_v60 = vld [vmem:[%s4343_s3 + $0x2e0] sm:$0xff]  ;;  %v3918_v61 = vld [vmem:[%s4343_s3 + $0x2e8] sm:$0xff] }
 0x192   : > { %1669 = vmatpush.msra.mxu0 %v3885_v17  ;;  %1689 = vmatpush.msrb.mxu1 %v3890_v19 }
 0x193   : > { %1800 = vmatpush.msra.mxu2 %v3693_v25  ;;  %1820 = vmatpush.msrb.mxu3 %v3698_v36  ;;  %v2424_v25 = vld [vmem:[%s4343_s3 + $0x2d8] sm:$0xff]  ;;  %v3937_v36 = vld [vmem:[%s4343_s3 + $0x2c0] sm:$0xff] }
 0x194   : > { %1670 = vmatpush.msra.mxu0 %v3899_v23  ;;  %1690 = vmatpush.msrb.mxu1 %v3904_v24 }
 0x195   : > { %1801 = vmatpush.msra.mxu2 %v3703_v37  ;;  %1821 = vmatpush.msrb.mxu3 %v3710_v40  ;;  %v2422_v37 = vld [vmem:[%s4343_s3 + $0x2c8] sm:$0xff]  ;;  %v3945_v40 = vrot.slane %v3664_v0, 2 }
 0x196   : > { %1671 = vmatpush.msra.mxu0 %v3913_v60  ;;  %1691 = vmatpush.msrb.mxu1 %v3918_v61 }
 0x197   : > { %1802 = vmatpush.msra.mxu2 %v3717_v41  ;;  %1822 = vmatpush.msrb.mxu3 %v3722_v1 }
 0x198   : > { %1672 = vmatpush.msra.mxu0 %v2423_v4  ;;  %1692 = vmatpush.msrb.mxu1 %v2424_v25 }
 0x199   : > { %1803 = vmatpush.msra.mxu2 %v3731_v50  ;;  %1823 = vmatpush.msrb.mxu3 %v3736_v51  ;;  %v1944_v51 = vld [vmem:[%s4345_s5 + $0x48] sm:$0xff] }
 0x19a   : > { %1673 = vmatpush.msra.mxu0 %v3937_v36  ;;  %1693 = vmatpush.msrb.mxu1 %v2422_v37 }
 0x19b   : > { %1804 = vmatpush.msra.mxu2 %v3749_v56  ;;  %1824 = vmatpush.msrb.mxu3 %v3754_v59  ;;  %v2476_v56 = vld [vmem:[%s4345_s5 + $0x98] sm:$0xff]  ;;  %v1943_v59 = vld [vmem:[%s4345_s5 + $0x40] sm:$0xff] }
 0x19c   : > { %2444 = vmatmul.msk.f32.vlgmr.msra.gmra.mxu0 %vm1378_vm3, %v3945_v40  ;;  %2446 = vmatmul.msk.f32.vlgmr.msrb.gmra.mxu1 %vm1378_vm3, %v3945_v40 }
 0x19d   : > { %2451 = vmatpush.msk.msrb.mxu0 %vm1382_vm1, %v3206_v43  ;;  %2453 = vmatpush.msk.msra.mxu1 %vm1382_vm1, %v3211_v44  ;;  %v1874_v43 = vrot.slane %v3782_v7, 2  ;;  %v4394_v44 = vld [vmem:[#allocation5_spill] sm:$0xff] }
 0x19e   : > { %1805 = vmatpush.msra.mxu2 %v3763_v62  ;;  %1825 = vmatpush.msrb.mxu3 %v3768_v63  ;;  %v2475_v63 = vld [vmem:[%s4345_s5 + $0x90] sm:$0xff] }
 0x19f   : > { %1756 = vmatpush.msrb.mxu0 %v3216_v45  ;;  %1776 = vmatpush.msra.mxu1 %v3225_v46  ;;  %v4395_v45 = vld [vmem:[#allocation6_spill] sm:$0xff]  ;;  %v4396_v46 = vld [vmem:[#allocation7_spill] sm:$0xff] }
 0x1a0   : > { %2456 = vmatmul.msk.f32.vlgmr.msra.gmra.mxu2 %vm1378_vm3, %v3799_v12  ;;  %2458 = vmatmul.msk.f32.vlgmr.msrb.gmra.mxu3 %vm1378_vm3, %v3799_v12 }
 0x1a1   : > { %2463 = vmatpush.msk.msrb.mxu2 %vm1382_vm1, %v3787_v8  ;;  %2465 = vmatpush.msk.msra.mxu3 %vm1382_vm1, %v3792_v11  ;;  %v2473_v8 = vld [vmem:[%s4345_s5 + $0x80] sm:$0xff]  ;;  %v2488_v11 = vld [vmem:[%s4345_s5 + $0xe8] sm:$0xff] }
 0x1a2   : > { %1757 = vmatpush.msrb.mxu0 %v3230_v47  ;;  %1777 = vmatpush.msra.mxu1 %v3235_v48  ;;  %v4397_v47 = vld [vmem:[#allocation8_spill] sm:$0xff]  ;;  %v4398_v48 = vld [vmem:[#allocation9_spill] sm:$0xff] }
 0x1a3   : > { %1883 = vmatpush.msrb.mxu2 %v3804_v18  ;;  %1903 = vmatpush.msra.mxu3 %v3809_v14  ;;  %v2487_v14 = vld [vmem:[%s4345_s5 + $0xe0] sm:$0xff] }
 0x1a4   : > { %1758 = vmatpush.msrb.mxu0 %v3242_v53  ;;  %1778 = vmatpush.msra.mxu1 %v3247_v54  ;;  %v4399_v53 = vld [vmem:[#allocation10_spill] sm:$0xff]  ;;  %v4400_v54 = vld [vmem:[#allocation11_spill] sm:$0xff] }
 0x1a5   : > { %1884 = vmatpush.msrb.mxu2 %v3822_v15  ;;  %1904 = vmatpush.msra.mxu3 %v3827_v16  ;;  %v1940_v16 = vld [vmem:[%s4345_s5 + $0x28] sm:$0xff] }
 0x1a6   : > { %1759 = vmatpush.msrb.mxu0 %v3254_v57  ;;  %1779 = vmatpush.msra.mxu1 %v3259_v58  ;;  %v4401_v57 = vld [vmem:[#allocation12_spill] sm:$0xff]  ;;  %v4402_v58 = vld [vmem:[#allocation13_spill] sm:$0xff] }
 0x1a7   : > { %1885 = vmatpush.msrb.mxu2 %v3838_v20  ;;  %1905 = vmatpush.msra.mxu3 %v3843_v22  ;;  %v2472_v20 = vld [vmem:[%s4345_s5 + $0x78] sm:$0xff] }
 0x1a8   : > { %1760 = vmatpush.msrb.mxu0 %v3277_v27  ;;  %1780 = vmatpush.msra.mxu1 %v3282_v28  ;;  %v4403_v27 = vld [vmem:[#allocation14_spill] sm:$0xff]  ;;  %v4404_v28 = vld [vmem:[#allocation15_spill] sm:$0xff] }
 0x1a9   : > { %1886 = vmatpush.msrb.mxu2 %v3855_v13  ;;  %1906 = vmatpush.msra.mxu3 %v3860_v26  ;;  %v1700_v13 = vld [vmem:[%s4344_s4] sm:$0x3] }
 0x1aa   : > { %1761 = vmatpush.msrb.mxu0 %v3287_v29  ;;  %1781 = vmatpush.msra.mxu1 %v3294_v21  ;;  %v4405_v29 = vld [vmem:[#allocation16_spill] sm:$0xff]  ;;  %v4406_v21 = vld [vmem:[#allocation17_spill] sm:$0xff] }
 0x1ab   : > { %1887 = vmatpush.msrb.mxu2 %v3869_v6  ;;  %1907 = vmatpush.msra.mxu3 %v3874_v9  ;;  %v1939_v9 = vld [vmem:[%s4345_s5 + $0x20] sm:$0xff] }
 0x1ac   : > { %1762 = vmatpush.msrb.mxu0 %v3299_v30  ;;  %1782 = vmatpush.msra.mxu1 %v3304_v31  ;;  %v4407_v30 = vld [vmem:[#allocation18_spill] sm:$0xff]  ;;  %v4408_v31 = vld [vmem:[#allocation19_spill] sm:$0xff] }
 0x1ad   : > { %1888 = vmatpush.msrb.mxu2 %v3885_v17  ;;  %1908 = vmatpush.msra.mxu3 %v3890_v19  ;;  %v2471_v17 = vld [vmem:[%s4345_s5 + $0x70] sm:$0xff] }
 0x1ae   : > { %1763 = vmatpush.msrb.mxu0 %v3311_v32  ;;  %1783 = vmatpush.msra.mxu1 %v3316_v33  ;;  %v4409_v32 = vld [vmem:[#allocation20_spill] sm:$0xff]  ;;  %v4410_v33 = vld [vmem:[#allocation21_spill] sm:$0xff] }
 0x1af   : > { %1889 = vmatpush.msrb.mxu2 %v3899_v23  ;;  %1909 = vmatpush.msra.mxu3 %v3904_v24  ;;  %v1938_v24 = vld [vmem:[%s4345_s5 + $0x18] sm:$0xff] }
 0x1b0   : > { %1764 = vmatpush.msrb.mxu0 %v3325_v34  ;;  %1784 = vmatpush.msra.mxu1 %v3330_v35  ;;  %v4411_v34 = vld [vmem:[#allocation22_spill] sm:$0xff] }
 0x1b1   : > { %1890 = vmatpush.msrb.mxu2 %v3913_v60  ;;  %1910 = vmatpush.msra.mxu3 %v3918_v61  ;;  %v2470_v60 = vld [vmem:[%s4345_s5 + $0x68] sm:$0xff]  ;;  %v1702_v61 = vperm.slane %v1700_v13, 0 }
 0x1b2   : > { %1765 = vmatpush.msrb.mxu0 %v3347_v38  ;;  %1785 = vmatpush.msra.mxu1 %v3352_v39 }
 0x1b3   : > { %1891 = vmatpush.msrb.mxu2 %v2423_v4  ;;  %1911 = vmatpush.msra.mxu3 %v2424_v25 }
 0x1b4   : > { %2452 = vmatmul.msk.f32.vlgmr.msrb.gmra.mxu0 %vm1378_vm3, %v3782_v7  ;;  %2454 = vmatmul.msk.f32.vlgmr.msra.gmra.mxu1 %vm1378_vm3, %v3782_v7  ;;  %v1941_v7 = vld [vmem:[%s4345_s5 + $0x30] sm:$0xff] }
 0x1b5   : > { %2459 = vmatpush.msk.msra.mxu0 %vm1382_vm1, %v3371_v42  ;;  %2461 = vmatpush.msk.msrb.mxu1 %vm1382_vm1, %v3378_v49 }
 0x1b6   : > { %1892 = vmatpush.msrb.mxu2 %v3937_v36  ;;  %1912 = vmatpush.msra.mxu3 %v2422_v37 }
 0x1b7   : > { %1838 = vmatpush.msra.mxu0 %v3395_v52  ;;  %1858 = vmatpush.msrb.mxu1 %v3400_v55 }
 0x1b8   : > { %2464 = vmatmul.msk.f32.vlgmr.msrb.gmra.mxu2 %vm1378_vm3, %v1874_v43  ;;  %2466 = vmatmul.msk.f32.vlgmr.msra.gmra.mxu3 %vm1378_vm3, %v1874_v43  ;;  %v2469_v43 = vld [vmem:[%s4345_s5 + $0x60] sm:$0xff] }
 0x1b9   : > { %1839 = vmatpush.msra.mxu0 %v4394_v44  ;;  %1859 = vmatpush.msrb.mxu1 %v4395_v45 }
 0x1ba   : > { %1989 = vmatpush.msrb.mxu3 %v1944_v51  ;;  %2023 = vmatpush.msra.mxu2 %v2488_v11  ;;  %v2498_v51 = vld [vmem:[%s4345_s5 + $0x130] sm:$0xff] }
 0x1bb   : > { %1840 = vmatpush.msra.mxu0 %v4396_v46  ;;  %1860 = vmatpush.msrb.mxu1 %v4397_v47  ;;  %v2507_v11 = vld [vmem:[%s4345_s5 + $0x170] sm:$0xff] }
 0x1bc   : > { %1990 = vmatpush.msrb.mxu3 %v1943_v59  ;;  %2024 = vmatpush.msra.mxu2 %v2487_v14  ;;  %v2483_v59 = vld [vmem:[%s4345_s5 + $0xc0] sm:$0xff]  ;;  %v2506_v14 = vld [vmem:[%s4345_s5 + $0x168] sm:$0xff] }
 0x1bd   : > { %1841 = vmatpush.msra.mxu0 %v4398_v48  ;;  %1861 = vmatpush.msrb.mxu1 %v4399_v53  ;;  %v1936_v53 = vld [vmem:[%s4345_s5 + $0x8] sm:$0xff] }
 0x1be   : > { %1991 = vmatpush.msrb.mxu3 %v1942_v2  ;;  %2025 = vmatpush.msra.mxu2 %v2486_v10  ;;  %v2482_v2 = vld [vmem:[%s4345_s5 + $0xb8] sm:$0xff] }
 0x1bf   : > { %1842 = vmatpush.msra.mxu0 %v4400_v54  ;;  %1862 = vmatpush.msrb.mxu1 %v4401_v57  ;;  %v2468_v54 = vld [vmem:[%s4345_s5 + $0x58] sm:$0xff] }
 0x1c0   : > { %1992 = vmatpush.msrb.mxu3 %v1941_v7  ;;  %v2481_v7 = vld [vmem:[%s4345_s5 + $0xb0] sm:$0xff]  ;;  %v2504_v10 = vld [vmem:[%s4345_s5 + $0x158] sm:$0xff] }
 0x1c1   : > { %1843 = vmatpush.msra.mxu0 %v4402_v58  ;;  %1863 = vmatpush.msrb.mxu1 %v4403_v27 }
 0x1c2   : > { %1993 = vmatpush.msrb.mxu3 %v1940_v16  ;;  %v2493_v16 = vld [vmem:[%s4345_s5 + $0x108] sm:$0xff] }
 0x1c3   : > { %1844 = vmatpush.msra.mxu0 %v4404_v28  ;;  %1864 = vmatpush.msrb.mxu1 %v4405_v29  ;;  %v1935_v28 = vld [vmem:[%s4345_s5] sm:$0xff] }
 0x1c4   : > { %1994 = vmatpush.msrb.mxu3 %v1939_v9  ;;  %v2502_v9 = vld [vmem:[%s4345_s5 + $0x148] sm:$0xff] }
 0x1c5   : > { %1845 = vmatpush.msra.mxu0 %v4406_v21  ;;  %1865 = vmatpush.msrb.mxu1 %v4407_v30 }
 0x1c6   : > { %1995 = vmatpush.msrb.mxu3 %v1938_v24  ;;  %v2124_v24 = vld [vmem:[%s4347_s7 + $0x68] sm:$0xff] }
 0x1c7   : > { %1846 = vmatpush.msra.mxu0 %v4408_v31  ;;  %1866 = vmatpush.msrb.mxu1 %v4409_v32 }
 0x1c9   : > { %1847 = vmatpush.msra.mxu0 %v4410_v33  ;;  %1867 = vmatpush.msrb.mxu1 %v4411_v34  ;;  %v1703_v34 = vperm.slane %v1700_v13, 1  ;;  %v2491_v13 = vld [vmem:[%s4345_s5 + $0xf8] sm:$0xff] }
 0x1ca   : > { %2460 = vmatmul.msk.f32.vlgmr.msra.gmra.mxu0 %vm1378_vm3, %v3945_v40  ;;  %2462 = vmatmul.msk.f32.vlgmr.msrb.gmra.mxu1 %vm1378_vm3, %v3945_v40  ;;  %v1937_v40 = vld [vmem:[%s4345_s5 + $0x10] sm:$0xff] }
 0x1cb   : > { %1967 = vmatpush.msrb.mxu0 %v2476_v56  ;;  %1996 = vmatpush.msrb.mxu3 %v1937_v40  ;;  %v2510_v56 = vld [vmem:[%s4345_s5 + $0x188] sm:$0xff] }
 0x1cd   : > { %1968 = vmatpush.msrb.mxu0 %v2475_v63  ;;  %1997 = vmatpush.msrb.mxu3 %v1936_v53  ;;  %v2509_v63 = vld [vmem:[%s4345_s5 + $0x180] sm:$0xff]  ;;  %v2118_v53 = vld [vmem:[%s4347_s7 + $0x38] sm:$0xff] }
 0x1cf   : > { %1969 = vmatpush.msrb.mxu0 %v2474_v3  ;;  %1998 = vmatpush.msrb.mxu3 %v1935_v28  ;;  %v2496_v3 = vld [vmem:[%s4345_s5 + $0x120] sm:$0xff]  ;;  %v2113_v28 = vld [vmem:[%s4347_s7 + $0x10] sm:$0xff] }
 0x1d1   : > { %1970 = vmatpush.msrb.mxu0 %v2473_v8  ;;  %v2495_v8 = vld [vmem:[%s4345_s5 + $0x118] sm:$0xff] }
 0x1d3   : > { %1971 = vmatpush.msrb.mxu0 %v2472_v20  ;;  %v2505_v20 = vld [vmem:[%s4345_s5 + $0x160] sm:$0xff] }
 0x1d5   : > { %1972 = vmatpush.msrb.mxu0 %v2471_v17  ;;  %v2501_v17 = vld [vmem:[%s4345_s5 + $0x140] sm:$0xff] }
 0x1d6   : > { %v1455_v39 = vpop.f32.mrf.mxu2  ;;  %v1475_v42 = vpop.f32.mrf.mxu3 }
 0x1d7   : > { %1973 = vmatpush.msrb.mxu0 %v2470_v60  ;;  %v2123_v60 = vld [vmem:[%s4347_s7 + $0x60] sm:$0xff] }
 0x1d9   : > { %1974 = vmatpush.msrb.mxu0 %v2469_v43 }
 0x1db   : > { %1975 = vmatpush.msrb.mxu0 %v2468_v54  ;;  %v2117_v54 = vld [vmem:[%s4347_s7 + $0x30] sm:$0xff] }
 0x200   : > { %v1406_v35 = vpop.f32.mrf.mxu0  ;;  %v1426_v38 = vpop.f32.mrf.mxu1 }
 0x201   : > { %v1456_v5 = vadd.f32 %v1455_v39, %v1406_v35  ;;  %v1476_v4 = vadd.f32 %v1475_v42, %v1426_v38 }
 0x208   : > { %v1601_v49 = vpop.f32.mrf.mxu2  ;;  %v4040_v0 = vpop.f32.mrf.mxu3 }
 0x209   : > { %v1527_v52 = vpop.f32.mrf.mxu0  ;;  %v1547_v55 = vpop.f32.mrf.mxu1 }
 0x20a   : > { %v1550_v15 = vadd.f32 %v1527_v52, %v1456_v5  ;;  %v1551_v46 = vadd.f32 %v1547_v55, %v1476_v4  ;;  %v2508_v5 = vld [vmem:[%s4345_s5 + $0x178] sm:$0xff] }
 0x20c   : > { %v1624_v23 = vadd.f32 %v1601_v49, %v1550_v15  ;;  %v1625_v21 = vadd.f32 %v4040_v0, %v1551_v46  ;;  %v2485_v0 = vld [vmem:[%s4345_s5 + $0xd0] sm:$0xff]  ;;  %v2479_v15 = vld [vmem:[%s4345_s5 + $0xa0] sm:$0xff] }
 0x20d   : > { %2026 = vmatpush.msra.mxu2 %v2485_v0  ;;  %v2121_v46 = vld [vmem:[%s4347_s7 + $0x50] sm:$0xff] }
 0x213   : > { %v1727_v50 = vpop.f32.mrf.mxu2  ;;  %v1747_v62 = vpop.f32.mrf.mxu3 }
 0x219   : > { %v1675_v41 = vpop.f32.mrf.mxu0  ;;  %v4042_v1 = vpop.f32.mrf.mxu1 }
 0x21a   : > { %v1698_v25 = vadd.f32 %v1675_v41, %v1624_v23  ;;  %v1699_v33 = vadd.f32 %v4042_v1, %v1625_v21  ;;  %v2499_v41 = vld [vmem:[%s4345_s5 + $0x138] sm:$0xff]  ;;  %v2467_v1 = vld [vmem:[%s4345_s5 + $0x50] sm:$0xff]  ;;  %v2111_v21 = vld [vmem:[%s4347_s7] sm:$0xff] }
 0x21b   : > { %2058 = vmatpush.msra.mxu3 %v2499_v41  ;;  %1976 = vmatpush.msrb.mxu0 %v2467_v1  ;;  %v2125_v23 = vld [vmem:[%s4347_s7 + $0x70] sm:$0xff]  ;;  %v2154_v41 = vld [vmem:[%s4349_s9 + $0x28] sm:$0xff] }
 0x21c   : > { %v1706_v58 = vadd.f32 %v1702_v61, %v1698_v25  ;;  %v1707_v42 = vadd.f32 %v1703_v34, %v1699_v33  ;;  %v2161_v33 = vld [vmem:[%s4349_s9 + $0x60] sm:$0xff] }
 0x21d   : > { %2059 = vmatpush.msra.mxu3 %v2498_v51  ;;  %2093 = vmatpush.msra.mxu0 %v2510_v56  ;;  %v2152_v56 = vld [vmem:[%s4349_s9 + $0x18] sm:$0xff] }
 0x21e   : > { %v1708_v32 = vmax.f32 %v1706_v58, 0.0  ;;  %v1709_v52 = vmax.f32 %v1707_v42, 0.0  ;;  %v2115_v58 = vld [vmem:[%s4347_s7 + $0x20] sm:$0xff]  ;;  %v2156_v42 = vld [vmem:[%s4349_s9 + $0x38] sm:$0xff] }
 0x21f   : > { %2094 = vmatpush.msra.mxu0 %v2509_v63 }
 0x221   : > { %2095 = vmatpush.msra.mxu0 %v2508_v5 }
 0x223   : > { %v1807_v22 = vpop.f32.mrf.mxu2  ;;  %v1827_v19 = vpop.f32.mrf.mxu3  ;;  %2096 = vmatpush.msra.mxu0 %v2507_v11  ;;  %v2150_v11 = vld [vmem:[%s4349_s9 + $0x8] sm:$0xff] }
 0x225   : > { %2097 = vmatpush.msra.mxu0 %v2506_v14 }
 0x227   : > { %2098 = vmatpush.msra.mxu0 %v2505_v20  ;;  %v2165_v20 = vld [vmem:[%s4350_s10] sm:$0x1] }
 0x229   : > { %2099 = vmatpush.msra.mxu0 %v2504_v10 }
 0x231   : > { %v1767_v12 = vpop.f32.mrf.mxu0  ;;  %v1787_v18 = vpop.f32.mrf.mxu1 }
 0x232   : > { %v1768_v26 = vadd.f32 %v1767_v12, %v1727_v50  ;;  %v1788_v6 = vadd.f32 %v1787_v18, %v1747_v62  ;;  %v2484_v50 = vld [vmem:[%s4345_s5 + $0xc8] sm:$0xff]  ;;  %v2494_v18 = vld [vmem:[%s4345_s5 + $0x110] sm:$0xff] }
 0x233   : > { %v2497_v62 = vld [vmem:[%s4345_s5 + $0x128] sm:$0xff]  ;;  %2027 = vmatpush.msra.mxu2 %v2484_v50  ;;  %v2153_v50 = vld [vmem:[%s4349_s9 + $0x20] sm:$0xff] }
 0x234   : > { %v1830_v36 = vadd.f32 %v1807_v22, %v1768_v26  ;;  %v1831_v37 = vadd.f32 %v1827_v19, %v1788_v6  ;;  %2060 = vmatpush.msra.mxu3 %v2497_v62  ;;  %v2480_v12 = vld [vmem:[%s4345_s5 + $0xa8] sm:$0xff]  ;;  %v2492_v22 = vld [vmem:[%s4345_s5 + $0x100] sm:$0xff]  ;;  %v2503_v26 = vld [vmem:[%s4345_s5 + $0x150] sm:$0xff] }
 0x235   : > { %2028 = vmatpush.msra.mxu2 %v2483_v59  ;;  %v2490_v6 = vld [vmem:[%s4345_s5 + $0xf0] sm:$0xff]  ;;  %2100 = vmatpush.msra.mxu0 %v2503_v26  ;;  %v2126_v19 = vld [vmem:[%s4347_s7 + $0x78] sm:$0xff] }
 0x236   : > { %2061 = vmatpush.msra.mxu3 %v2496_v3  ;;  %2128 = vmatpush.msra.mxu1 %v2126_v19 }
 0x237   : > { %2029 = vmatpush.msra.mxu2 %v2482_v2  ;;  %2101 = vmatpush.msra.mxu0 %v2502_v9  ;;  %v2108_v2 = vld [vmem:[%s4346_s6] sm:$0x1] }
 0x238   : > { %2062 = vmatpush.msra.mxu3 %v2495_v8  ;;  %2129 = vmatpush.msra.mxu1 %v2125_v23  ;;  %v2151_v8 = vld [vmem:[%s4349_s9 + $0x10] sm:$0xff] }
 0x239   : > { %2030 = vmatpush.msra.mxu2 %v2481_v7  ;;  %2102 = vmatpush.msra.mxu0 %v2501_v17 }
 0x23a   : > { %2063 = vmatpush.msra.mxu3 %v2494_v18  ;;  %2130 = vmatpush.msra.mxu1 %v2124_v24  ;;  %v2127_v18 = vld [vmem:[%s4348_s8] sm:$0x1] }
 0x23b   : > { %v1894_v57 = vpop.f32.mrf.mxu2  ;;  %v1914_v29 = vpop.f32.mrf.mxu3  ;;  %2031 = vmatpush.msra.mxu2 %v2480_v12  ;;  %v2149_v12 = vld [vmem:[%s4349_s9] sm:$0xff] }
 0x23c   : > { %2064 = vmatpush.msra.mxu3 %v2493_v16  ;;  %2131 = vmatpush.msra.mxu1 %v2123_v60 }
 0x23d   : > { %2032 = vmatpush.msra.mxu2 %v2479_v15 }
 0x23e   : > { %2065 = vmatpush.msra.mxu3 %v2492_v22 }
 0x240   : > { %2066 = vmatpush.msra.mxu3 %v2491_v13 }
 0x242   : > { %2067 = vmatpush.msra.mxu3 %v2490_v6 }
 0x247   : > { %v1849_v44 = vpop.f32.mrf.mxu0  ;;  %v1869_v45 = vpop.f32.mrf.mxu1 }
 0x248   : > { %v1872_v47 = vadd.f32 %v1849_v44, %v1830_v36  ;;  %v1873_v48 = vadd.f32 %v1869_v45, %v1831_v37 }
 0x24a   : > { %v1917_v27 = vadd.f32 %v1894_v57, %v1872_v47  ;;  %v1918_v30 = vadd.f32 %v1914_v29, %v1873_v48  ;;  %v2120_v47 = vld [vmem:[%s4347_s7 + $0x48] sm:$0xff]  ;;  %v2119_v48 = vld [vmem:[%s4347_s7 + $0x40] sm:$0xff] }
 0x24b   : > { %v2116_v57 = vld [vmem:[%s4347_s7 + $0x28] sm:$0xff] }
 0x24c   : > { %v1919_v31 = vadd.f32 %v1917_v27, %v1702_v61  ;;  %v1920_v38 = vadd.f32 %v1918_v30, %v1703_v34  ;;  %v2122_v61 = vld [vmem:[%s4347_s7 + $0x58] sm:$0xff]  ;;  %v2112_v29 = vld [vmem:[%s4347_s7 + $0x8] sm:$0xff] }
 0x24d   : > { %2132 = vmatpush.msra.mxu1 %v2122_v61  ;;  %v2114_v27 = vld [vmem:[%s4347_s7 + $0x18] sm:$0xff] }
 0x24e   : > { %v1921_v35 = vmax.f32 %v1919_v31, 0.0  ;;  %v1922_v49 = vmax.f32 %v1920_v38, 0.0  ;;  %v2164_v30 = vld [vmem:[%s4349_s9 + $0x78] sm:$0xff]  ;;  %v2163_v31 = vld [vmem:[%s4349_s9 + $0x70] sm:$0xff]  ;;  %v2158_v38 = vld [vmem:[%s4349_s9 + $0x48] sm:$0xff] }
 0x24f   : > { %2133 = vmatpush.msra.mxu1 %v2121_v46  ;;  %2166 = vmatpush.msrb.mxu2 %v2164_v30  ;;  %v2160_v34 = vld [vmem:[%s4349_s9 + $0x58] sm:$0xff] }
 0x250   : > { %v4115_v39 = vmax.f32 %v1708_v32, %v1921_v35  ;;  %v1924_v55 = vmax.f32 %v1709_v52, %v1922_v49  ;;  %v2162_v32 = vld [vmem:[%s4349_s9 + $0x68] sm:$0xff]  ;;  %v2159_v35 = vld [vmem:[%s4349_s9 + $0x50] sm:$0xff] }
 0x251   : > { %2134 = vmatpush.msra.mxu1 %v2120_v47  ;;  %2167 = vmatpush.msrb.mxu2 %v2163_v31 }
 0x252   : > { %1927 = vrot.lane.b32.xlu2 %v4115_v39, %s2621_s12 }
 0x253   : > { %2135 = vmatpush.msra.mxu1 %v2119_v48  ;;  %2168 = vmatpush.msrb.mxu2 %v2162_v32 }
 0x255   : > { %2136 = vmatpush.msra.mxu1 %v2118_v53  ;;  %2169 = vmatpush.msrb.mxu2 %v2161_v33 }
 0x257   : > { %2137 = vmatpush.msra.mxu1 %v2117_v54  ;;  %2170 = vmatpush.msrb.mxu2 %v2160_v34 }
 0x259   : > { %2138 = vmatpush.msra.mxu1 %v2116_v57  ;;  %2171 = vmatpush.msrb.mxu2 %v2159_v35 }
 0x25a   : > { %1929 = vrot.lane.b32.xlu2 %v1924_v55, %s2621_s12  ;;  %v2155_v55 = vld [vmem:[%s4349_s9 + $0x30] sm:$0xff] }
 0x25b   : > { %2139 = vmatpush.msra.mxu1 %v2115_v58  ;;  %2172 = vmatpush.msrb.mxu2 %v2158_v38 }
 0x25d   : > { %2140 = vmatpush.msra.mxu1 %v2114_v27 }
 0x25f   : > { %2141 = vmatpush.msra.mxu1 %v2113_v28 }
 0x261   : > { %2142 = vmatpush.msra.mxu1 %v2112_v29 }
 0x263   : > { %2143 = vmatpush.msra.mxu1 %v2111_v21 }
 0x2ac   : > { %v1928_v4 = vpop.permute.xlu2 %1927 }
 0x2b4   : > { %v1930_v25 = vpop.permute.xlu2 %1929 }
 0x2b5   : > { %v1932_v36 = vsel %vm1931_vm4, %v1928_v4, %v1930_v25 }
 0x2b6   : > { %v1934_v37 = vmax.f32 %v4115_v39, %v1932_v36  ;;  %v2157_v39 = vld [vmem:[%s4349_s9 + $0x40] sm:$0xff] }
 0x2b7   : > { %2173 = vmatpush.msrb.mxu2 %v2157_v39 }
 0x2b8   : > { %2478 = vmatmul.msk.f32.vlgmr.msrb.gmra.mxu3 %vm1958_vm5, %v1934_v37  ;;  %v1957_v40 = vrot.slane %v1934_v37, 1  ;;  %v2014_v43 = vrot.slane %v1934_v37, 2  ;;  %v2049_v44 = vrot.slane %v1934_v37, 3  ;;  %v2084_v45 = vrot.slane %v1934_v37, 4 }
 0x2b9   : > { %2174 = vmatpush.msrb.mxu2 %v2156_v42 }
 0x2ba   : > { %2477 = vmatmul.msk.f32.vlgmr.msrb.gmra.mxu0 %vm1958_vm5, %v1957_v40  ;;  %2489 = vmatmul.msk.f32.vlgmr.msra.gmra.mxu2 %vm1958_vm5, %v2014_v43 }
 0x2bb   : > { %2175 = vmatpush.msrb.mxu2 %v2155_v55 }
 0x2bd   : > { %2176 = vmatpush.msrb.mxu2 %v2154_v41 }
 0x2bf   : > { %2177 = vmatpush.msrb.mxu2 %v2153_v50 }
 0x2c0   : > { %2500 = vmatmul.msk.f32.vlgmr.msra.gmra.mxu3 %vm1958_vm5, %v2049_v44 }
 0x2c1   : > { %2178 = vmatpush.msrb.mxu2 %v2152_v56 }
 0x2c2   : > { %2511 = vmatmul.msk.f32.vlgmr.msra.gmra.mxu0 %vm1958_vm5, %v2084_v45 }
 0x2c3   : > { %2179 = vmatpush.msrb.mxu2 %v2151_v8 }
 0x2c5   : > { %2180 = vmatpush.msrb.mxu2 %v2150_v11 }
 0x2c7   : > { %2181 = vmatpush.msrb.mxu2 %v2149_v12 }
 0x337   : > { %v1978_v49 = vpop.f32.mrf.mxu0 }
 0x33b   : > { %v2000_v52 = vpop.f32.mrf.mxu3 }
 0x33c   : > { %v2001_v0 = vadd.f32 %v2000_v52, %v1978_v49 }
 0x33d   : > { %v2034_v1 = vpop.f32.mrf.mxu2 }
 0x33e   : > { %v2037_v51 = vadd.f32 %v2034_v1, %v2001_v0 }
 0x33f   : > { %v2104_v63 = vpop.f32.mrf.mxu0 }
 0x343   : > { %v2069_v59 = vpop.f32.mrf.mxu3 }
 0x344   : > { %v2072_v62 = vadd.f32 %v2069_v59, %v2037_v51 }
 0x346   : > { %v2107_v3 = vadd.f32 %v2104_v63, %v2072_v62 }
 0x348   : > { %v2109_v5 = vadd.f32 %v2108_v2, %v2107_v3 }
 0x34a   : > { %v2110_v7 = vmax.f32 %v2109_v5, 0.0 }
 0x34c   : > { %2144 = vmatmul.f32.vlgmr.msra.gmra.mxu1 %v2110_v7 }
 0x3c9   : > { %v2145_v14 = vpop.f32.mrf.mxu1 }
 0x3ca   : > { %v2146_v15 = vadd.f32 %v2145_v14, %v2127_v18 }
 0x3cc   : > { %v2148_v16 = vmax.f32 %v2146_v15, 0.0 }
 0x3ce   : > { %2182 = vmatmul.f32.vlgmr.msrb.gmra.mxu2 %v2148_v16 }
 0x451   : > { %v2183_v22 = vpop.f32.mrf.mxu2 }
 0x452   : > { %v2184_v10 = vadd.f32 %v2183_v22, %v2165_v20 }
 0x454   : > { %2186 = vst [vmem:[%s378_s30] sm:$0x1] %v2184_v10 }
 0x455   : > { %2583 = shalt.err (!%p2580_p3)
}
 0x456   : > { %2515 = dma.vmem_to_hbm [thread:$0]  (%p2720_p5), %s2199_s13, 16, %s2201_s0, %s2188_s14  }
 0x457 PF: > { %p2521_p4 = scmp.ge.s32.totalorder %s2618_s20, 2  ;;  %s2212_s16 = sand.u32 1, %s2606_s17  }
 0x458   : > { %s2213_s29 = scalar_lea.sflag [#allocation3], %s2212_s16 }
 0x459   : > { %p2518_p7 = pnand %p2521_p4, %p2724_p6 }
 0x45b   : > { %p2519_p8 = pneg %p2518_p7 }
 0x45d   : > { %2601 = dma.done.wait (%p2519_p8), %s2213_s29, 16  }
 0x45e   : > { %2603 = vsyncadd (%p2519_p8), %s2213_s29, 4294967280  ;;  %p21_p9 = scmp.ge.s32.totalorder %s2707_s23, 4   ;;  %s4412_s17 = smov %s2610_s18 }
 0x45f   : > { %s4413_s18 = smov %s2614_s19  ;;  %s4414_s19 = smov %s2718_s26 }
 0x460   : > { %s4415_s20 = smov %s2707_s23  ;;  %23 = sbr.rel (!%p21_p9) target bundleno = 6 (0x6), region = 114 }
 0x465   :  { %2218 = vsyncpa [#allocation3], 1 }
 0x466   :  { %2220 = vsyncpa [#allocation3 + $0x1], 1 }

</bundles_post_ra>
